<compile_context>
chip_gen: v6e
topology: v6e:2x2x1
jax: 0.10.0
libtpu: 0.0.40
codegen_flags: <defaults>
</compile_context>

<pallas_src>
import functools
import math

import jax
import jax.numpy as jnp
from jax.experimental import pallas as pl
from jax.experimental.pallas import tpu as pltpu

# ---------------- tiny-BERT config (shapes implied by BertForSequenceClassification) ----
VOCAB = 100
HIDDEN = 32
N_LAYERS = 2
N_HEADS = 2
HEAD_DIM = HIDDEN // N_HEADS
INTERMEDIATE = 64
MAX_POS = 16
TYPE_VOCAB = 2
NUM_LABELS = 3             # num_labels=3 in the PyTorch module
PAD_LABELS = 128           # classifier lane-padded output width
LN_EPS = 1e-12             # BERT LayerNorm eps
MASK_NEG = -1e9            # finite additive-mask value (avoids NaN for fully-masked rows)
ATTN_SCALE = 1.0 / math.sqrt(HEAD_DIM)


# ---------------- in-kernel math helpers -------------------------------------------------
def _gelu(x):
    # tanh-approx GELU (single EUP tanh).  TODO(synk): exact HF "gelu" uses erf; the tanh
    # approximation deviates by <~1e-3 abs.
    c = math.sqrt(2.0 / math.pi)
    return 0.5 * x * (1.0 + jnp.tanh(c * (x + 0.044715 * x * x * x)))


def _layernorm(x, g, b):
    mean = jnp.mean(x, axis=-1, keepdims=True)
    var = jnp.mean(jnp.square(x - mean), axis=-1, keepdims=True)
    return (x - mean) * jax.lax.rsqrt(var + LN_EPS) * g + b


# ---------------- fused forward kernel ----------------------------------------------------
def _bert_fused_kernel(emb_ref, mask_ref,
                       emb_ln_g_ref, emb_ln_b_ref,
                       qkv_w_ref, qkv_b_ref,
                       ao_w_ref, ao_b_ref,
                       ln1_g_ref, ln1_b_ref,
                       i_w_ref, i_b_ref,
                       o_w_ref, o_b_ref,
                       ln2_g_ref, ln2_b_ref,
                       pool_w_ref, pool_b_ref,
                       cls_w_ref, cls_b_ref,
                       logits_ref, *, batch, seq):
    # ---- embeddings LayerNorm (no residual) ----
    h = _layernorm(emb_ref[...], emb_ln_g_ref[...], emb_ln_b_ref[...])   # (B*S, H)

    # ---- additive attention mask built in-kernel from the raw (B, S) mask ----
    amask = (1.0 - mask_ref[...]) * MASK_NEG                              # (B, S)

    # ---- encoder layers (unrolled; everything stays in VMEM/vregs) ----
    for l in range(N_LAYERS):
        # fused QKV projection: (B*S, H) @ (H, 3H)
        qkv = jnp.dot(h, qkv_w_ref[l], preferred_element_type=jnp.float32) + qkv_b_ref[l]

        # per-(batch, head) attention with static slices; B*nH = 4 tiny matmul pairs
        batch_ctx = []
        for b in range(batch):
            r0 = b * seq
            mrow = amask[b:b + 1, :]                                      # (1, S) -> bcast
            head_ctx = []
            for hd in range(N_HEADS):
                c0 = hd * HEAD_DIM
                qb = qkv[r0:r0 + seq, c0:c0 + HEAD_DIM]                   # (S, Dh)
                kb = qkv[r0:r0 + seq, HIDDEN + c0:HIDDEN + c0 + HEAD_DIM]
                vb = qkv[r0:r0 + seq, 2 * HIDDEN + c0:2 * HIDDEN + c0 + HEAD_DIM]
                s = jnp.einsum("qd,kd->qk", qb, kb,
                               preferred_element_type=jnp.float32) * ATTN_SCALE
                s = s + mrow
                s = s - jnp.max(s, axis=-1, keepdims=True)
                p = jnp.exp(s)
                p = p * pl.reciprocal(jnp.sum(p, axis=-1, keepdims=True), approx=True)
                head_ctx.append(jnp.dot(p, vb, preferred_element_type=jnp.float32))
            batch_ctx.append(jnp.concatenate(head_ctx, axis=-1))          # (S, H)
        ctx = jnp.concatenate(batch_ctx, axis=0)                          # (B*S, H)

        # attention output projection + residual + LayerNorm
        attn_out = jnp.dot(ctx, ao_w_ref[l], preferred_element_type=jnp.float32) + ao_b_ref[l]
        h = _layernorm(attn_out + h, ln1_g_ref[l], ln1_b_ref[l])

        # feed-forward (GELU) + residual + LayerNorm
        inter = _gelu(jnp.dot(h, i_w_ref[l], preferred_element_type=jnp.float32) + i_b_ref[l])
        ffn = jnp.dot(inter, o_w_ref[l], preferred_element_type=jnp.float32) + o_b_ref[l]
        h = _layernorm(ffn + h, ln2_g_ref[l], ln2_b_ref[l])

    # ---- pooler (dense + tanh on [CLS]) + classifier head ----
    cls_rows = jnp.concatenate([h[b * seq:b * seq + 1, :] for b in range(batch)], axis=0)
    pooled = jnp.tanh(jnp.dot(cls_rows, pool_w_ref[...],
                              preferred_element_type=jnp.float32) + pool_b_ref[...])
    logits = jnp.dot(pooled, cls_w_ref[...],
                     preferred_element_type=jnp.float32) + cls_b_ref[...]
    logits_ref[...] = logits.astype(logits_ref.dtype)                    # (B, 128) dense store


# ---------------- parameters (deterministic synthetic init, pre-packed for the kernel) ----
def init_params(key):
    def normal(k, shape):
        return 0.02 * jax.random.normal(k, shape, dtype=jnp.float32)

    keys = iter(jax.random.split(key, 3 + N_LAYERS * 6 + 2))
    p = {
        "word_emb": normal(next(keys), (VOCAB, HIDDEN)),
        "pos_emb": normal(next(keys), (MAX_POS, HIDDEN)),
        "type_emb": normal(next(keys), (TYPE_VOCAB, HIDDEN)),
        "emb_ln_g": jnp.ones((1, HIDDEN), jnp.float32),
        "emb_ln_b": jnp.zeros((1, HIDDEN), jnp.float32),
    }
    qkv_w, ao_w, i_w, o_w = [], [], [], []
    for _ in range(N_LAYERS):
        qw = normal(next(keys), (HIDDEN, HIDDEN))
        kw = normal(next(keys), (HIDDEN, HIDDEN))
        vw = normal(next(keys), (HIDDEN, HIDDEN))
        qkv_w.append(jnp.concatenate([qw, kw, vw], axis=1))          # (H, 3H) fused QKV
        ao_w.append(normal(next(keys), (HIDDEN, HIDDEN)))
        i_w.append(normal(next(keys), (HIDDEN, INTERMEDIATE)))
        o_w.append(normal(next(keys), (INTERMEDIATE, HIDDEN)))
    p["qkv_w"] = jnp.stack(qkv_w)                                    # (L, H, 3H)
    p["qkv_b"] = jnp.zeros((N_LAYERS, 1, 3 * HIDDEN), jnp.float32)
    p["ao_w"] = jnp.stack(ao_w)                                      # (L, H, H)
    p["ao_b"] = jnp.zeros((N_LAYERS, 1, HIDDEN), jnp.float32)
    p["ln1_g"] = jnp.ones((N_LAYERS, 1, HIDDEN), jnp.float32)
    p["ln1_b"] = jnp.zeros((N_LAYERS, 1, HIDDEN), jnp.float32)
    p["i_w"] = jnp.stack(i_w)                                        # (L, H, I)
    p["i_b"] = jnp.zeros((N_LAYERS, 1, INTERMEDIATE), jnp.float32)
    p["o_w"] = jnp.stack(o_w)                                        # (L, I, H)
    p["o_b"] = jnp.zeros((N_LAYERS, 1, HIDDEN), jnp.float32)
    p["ln2_g"] = jnp.ones((N_LAYERS, 1, HIDDEN), jnp.float32)
    p["ln2_b"] = jnp.zeros((N_LAYERS, 1, HIDDEN), jnp.float32)
    p["pool_w"] = normal(next(keys), (HIDDEN, HIDDEN))
    p["pool_b"] = jnp.zeros((1, HIDDEN), jnp.float32)
    cls_w = normal(next(keys), (HIDDEN, NUM_LABELS))
    p["cls_w"] = jnp.pad(cls_w, ((0, 0), (0, PAD_LABELS - NUM_LABELS)))  # lane-padded head
    p["cls_b"] = jnp.zeros((1, PAD_LABELS), jnp.float32)
    return p


# ---------------- forward pass (== CustomBERTClassifier.forward -> outputs.logits) -------
def _full_spec(x):
    nd = x.ndim
    return pl.BlockSpec(x.shape, lambda i, _nd=nd: (0,) * _nd)


def bert_classifier_forward(params, input_ids, token_type_ids, attention_mask):
    B, S = input_ids.shape

    # --- embedding gathers are plain-JAX glue (no clean Pallas gather needed here) ---
    pos_ids = jnp.arange(S, dtype=jnp.int32)[None, :]
    emb = (jnp.take(params["word_emb"], input_ids, axis=0)
           + jnp.take(params["pos_emb"], pos_ids, axis=0)
           + jnp.take(params["type_emb"], token_type_ids, axis=0))
    emb = emb.reshape(B * S, HIDDEN).astype(jnp.float32)
    mask = attention_mask.astype(jnp.float32)                      # raw (B, S) mask only

    operands = [
        emb, mask,
        params["emb_ln_g"], params["emb_ln_b"],
        params["qkv_w"], params["qkv_b"],
        params["ao_w"], params["ao_b"],
        params["ln1_g"], params["ln1_b"],
        params["i_w"], params["i_b"],
        params["o_w"], params["o_b"],
        params["ln2_g"], params["ln2_b"],
        params["pool_w"], params["pool_b"],
        params["cls_w"], params["cls_b"],
    ]

    kernel = functools.partial(_bert_fused_kernel, batch=B, seq=S)
    logits_pad = pl.pallas_call(
        kernel,
        out_shape=jax.ShapeDtypeStruct((B, PAD_LABELS), jnp.float32),
        grid=(1,),
        in_specs=[_full_spec(x) for x in operands],
        out_specs=pl.BlockSpec((B, PAD_LABELS), lambda i: (0, 0)),
        compiler_params=pltpu.CompilerParams(dimension_semantics=("arbitrary",)),
    )(*operands)
    # TODO(synk): dropout layers are identity at inference and are omitted.
    return logits_pad[:, :NUM_LABELS]                               # (B, num_labels)


# ---------------- demo ---------------------------------------------------------------------
if __name__ == "__main__":
    key = jax.random.PRNGKey(0)
    pkey, ikey = jax.random.split(key)
    params = init_params(pkey)

    B, S = 2, 8
    input_ids = jax.random.randint(ikey, (B, S), 0, VOCAB, dtype=jnp.int32)
    token_type_ids = jnp.zeros((B, S), jnp.int32)
    attention_mask = jnp.ones((B, S), jnp.int32)

    fwd = jax.jit(bert_classifier_forward)
    logits = fwd(params, input_ids, token_type_ids, attention_mask)
    logits = jax.block_until_ready(logits)
    assert logits.shape == (B, NUM_LABELS) and logits.dtype == jnp.float32
    print("KERNEL_OK")
</pallas_src>

<mosaic_0001>
module attributes {stable_mosaic.version = 11 : i64} {
  func.func @_bert_fused_kernel(%arg0: i32, %arg1: memref<16x32xf32, #tpu.memory_space<vmem>>, %arg2: memref<2x8xf32, #tpu.memory_space<vmem>>, %arg3: memref<1x32xf32, #tpu.memory_space<vmem>>, %arg4: memref<1x32xf32, #tpu.memory_space<vmem>>, %arg5: memref<2x32x96xf32, #tpu.memory_space<vmem>>, %arg6: memref<2x1x96xf32, #tpu.memory_space<vmem>>, %arg7: memref<2x32x32xf32, #tpu.memory_space<vmem>>, %arg8: memref<2x1x32xf32, #tpu.memory_space<vmem>>, %arg9: memref<2x1x32xf32, #tpu.memory_space<vmem>>, %arg10: memref<2x1x32xf32, #tpu.memory_space<vmem>>, %arg11: memref<2x32x64xf32, #tpu.memory_space<vmem>>, %arg12: memref<2x1x64xf32, #tpu.memory_space<vmem>>, %arg13: memref<2x64x32xf32, #tpu.memory_space<vmem>>, %arg14: memref<2x1x32xf32, #tpu.memory_space<vmem>>, %arg15: memref<2x1x32xf32, #tpu.memory_space<vmem>>, %arg16: memref<2x1x32xf32, #tpu.memory_space<vmem>>, %arg17: memref<32x32xf32, #tpu.memory_space<vmem>>, %arg18: memref<1x32xf32, #tpu.memory_space<vmem>>, %arg19: memref<32x128xf32, #tpu.memory_space<vmem>>, %arg20: memref<1x128xf32, #tpu.memory_space<vmem>>, %arg21: memref<2x128xf32, #tpu.memory_space<vmem>>) attributes {dimension_semantics = [#tpu.dimension_semantics<arbitrary>], iteration_bounds = array<i64: 1>, scalar_prefetch = 0 : i64, scratch_operands = 0 : i64, tpu.core_type = #tpu.core_type<tc>, window_params = [{pipeline_mode = #tpu.pipeline_mode<synchronous>, transform_indices = @transform_0, window_bounds = array<i64: 16, 32>}, {pipeline_mode = #tpu.pipeline_mode<synchronous>, transform_indices = @transform_1, window_bounds = array<i64: 2, 8>}, {pipeline_mode = #tpu.pipeline_mode<synchronous>, transform_indices = @transform_2, window_bounds = array<i64: 1, 32>}, {pipeline_mode = #tpu.pipeline_mode<synchronous>, transform_indices = @transform_3, window_bounds = array<i64: 1, 32>}, {pipeline_mode = #tpu.pipeline_mode<synchronous>, transform_indices = @transform_4, window_bounds = array<i64: 2, 32, 96>}, {pipeline_mode = #tpu.pipeline_mode<synchronous>, transform_indices = @transform_5, window_bounds = array<i64: 2, 1, 96>}, {pipeline_mode = #tpu.pipeline_mode<synchronous>, transform_indices = @transform_6, window_bounds = array<i64: 2, 32, 32>}, {pipeline_mode = #tpu.pipeline_mode<synchronous>, transform_indices = @transform_7, window_bounds = array<i64: 2, 1, 32>}, {pipeline_mode = #tpu.pipeline_mode<synchronous>, transform_indices = @transform_8, window_bounds = array<i64: 2, 1, 32>}, {pipeline_mode = #tpu.pipeline_mode<synchronous>, transform_indices = @transform_9, window_bounds = array<i64: 2, 1, 32>}, {pipeline_mode = #tpu.pipeline_mode<synchronous>, transform_indices = @transform_10, window_bounds = array<i64: 2, 32, 64>}, {pipeline_mode = #tpu.pipeline_mode<synchronous>, transform_indices = @transform_11, window_bounds = array<i64: 2, 1, 64>}, {pipeline_mode = #tpu.pipeline_mode<synchronous>, transform_indices = @transform_12, window_bounds = array<i64: 2, 64, 32>}, {pipeline_mode = #tpu.pipeline_mode<synchronous>, transform_indices = @transform_13, window_bounds = array<i64: 2, 1, 32>}, {pipeline_mode = #tpu.pipeline_mode<synchronous>, transform_indices = @transform_14, window_bounds = array<i64: 2, 1, 32>}, {pipeline_mode = #tpu.pipeline_mode<synchronous>, transform_indices = @transform_15, window_bounds = array<i64: 2, 1, 32>}, {pipeline_mode = #tpu.pipeline_mode<synchronous>, transform_indices = @transform_16, window_bounds = array<i64: 32, 32>}, {pipeline_mode = #tpu.pipeline_mode<synchronous>, transform_indices = @transform_17, window_bounds = array<i64: 1, 32>}, {pipeline_mode = #tpu.pipeline_mode<synchronous>, transform_indices = @transform_18, window_bounds = array<i64: 32, 128>}, {pipeline_mode = #tpu.pipeline_mode<synchronous>, transform_indices = @transform_19, window_bounds = array<i64: 1, 128>}, {pipeline_mode = #tpu.pipeline_mode<synchronous>, transform_indices = @transform_20, window_bounds = array<i64: 2, 128>}]} {
    %c0 = arith.constant 0 : index
    %c0_0 = arith.constant 0 : index
    %0 = vector.load %arg1[%c0, %c0_0] : memref<16x32xf32, #tpu.memory_space<vmem>>, vector<16x32xf32>
    %c0_1 = arith.constant 0 : index
    %c0_2 = arith.constant 0 : index
    %1 = vector.load %arg3[%c0_1, %c0_2] : memref<1x32xf32, #tpu.memory_space<vmem>>, vector<1x32xf32>
    %c0_3 = arith.constant 0 : index
    %c0_4 = arith.constant 0 : index
    %2 = vector.load %arg4[%c0_3, %c0_4] : memref<1x32xf32, #tpu.memory_space<vmem>>, vector<1x32xf32>
    %cst = arith.constant dense<0.000000e+00> : vector<16xf32>
    %3 = vector.multi_reduction <add>, %0, %cst [1] : vector<16x32xf32> to vector<16xf32>
    %4 = vector.shape_cast %3 : vector<16xf32> to vector<16x1xf32>
    %cst_5 = arith.constant 3.200000e+01 : f32
    %5 = vector.broadcast %cst_5 : f32 to vector<16x1xf32>
    %6 = arith.divf %4, %5 : vector<16x1xf32>
    %7 = vector.broadcast %6 : vector<16x1xf32> to vector<16x32xf32>
    %8 = arith.subf %0, %7 : vector<16x32xf32>
    %9 = arith.mulf %8, %8 : vector<16x32xf32>
    %cst_6 = arith.constant dense<0.000000e+00> : vector<16xf32>
    %10 = vector.multi_reduction <add>, %9, %cst_6 [1] : vector<16x32xf32> to vector<16xf32>
    %11 = vector.shape_cast %10 : vector<16xf32> to vector<16x1xf32>
    %cst_7 = arith.constant 3.200000e+01 : f32
    %12 = vector.broadcast %cst_7 : f32 to vector<16x1xf32>
    %13 = arith.divf %11, %12 : vector<16x1xf32>
    %14 = vector.broadcast %6 : vector<16x1xf32> to vector<16x32xf32>
    %15 = arith.subf %0, %14 : vector<16x32xf32>
    %cst_8 = arith.constant 9.99999996E-13 : f32
    %16 = vector.broadcast %cst_8 : f32 to vector<16x1xf32>
    %17 = arith.addf %13, %16 : vector<16x1xf32>
    %18 = math.rsqrt %17 : vector<16x1xf32>
    %19 = vector.broadcast %18 : vector<16x1xf32> to vector<16x32xf32>
    %20 = arith.mulf %15, %19 : vector<16x32xf32>
    %21 = vector.broadcast %1 : vector<1x32xf32> to vector<16x32xf32>
    %22 = arith.mulf %20, %21 : vector<16x32xf32>
    %23 = vector.broadcast %2 : vector<1x32xf32> to vector<16x32xf32>
    %24 = arith.addf %22, %23 : vector<16x32xf32>
    %c0_9 = arith.constant 0 : index
    %c0_10 = arith.constant 0 : index
    %25 = vector.load %arg2[%c0_9, %c0_10] : memref<2x8xf32, #tpu.memory_space<vmem>>, vector<2x8xf32>
    %cst_11 = arith.constant 1.000000e+00 : f32
    %26 = vector.broadcast %cst_11 : f32 to vector<2x8xf32>
    %27 = arith.subf %26, %25 : vector<2x8xf32>
    %cst_12 = arith.constant -1.000000e+09 : f32
    %28 = vector.broadcast %cst_12 : f32 to vector<2x8xf32>
    %29 = arith.mulf %27, %28 : vector<2x8xf32>
    %c0_13 = arith.constant 0 : index
    %c0_14 = arith.constant 0 : index
    %c0_15 = arith.constant 0 : index
    %30 = vector.load %arg5[%c0_13, %c0_14, %c0_15] : memref<2x32x96xf32, #tpu.memory_space<vmem>>, vector<1x32x96xf32>
    %31 = vector.shape_cast %30 : vector<1x32x96xf32> to vector<32x96xf32>
    %cst_16 = arith.constant dense<0.000000e+00> : vector<16x96xf32>
    %32 = tpu.matmul %24, %31, %cst_16 {dimension_numbers = #tpu.dot_dimension_numbers<[1], [0], [0], [1], [0, 0, 1, 1], [], []>} : vector<16x32xf32>, vector<32x96xf32>, vector<16x96xf32> -> vector<16x96xf32>
    %c0_17 = arith.constant 0 : index
    %c0_18 = arith.constant 0 : index
    %c0_19 = arith.constant 0 : index
    %33 = vector.load %arg6[%c0_17, %c0_18, %c0_19] : memref<2x1x96xf32, #tpu.memory_space<vmem>>, vector<1x1x96xf32>
    %34 = vector.shape_cast %33 : vector<1x1x96xf32> to vector<1x96xf32>
    %35 = vector.broadcast %34 : vector<1x96xf32> to vector<16x96xf32>
    %36 = arith.addf %32, %35 : vector<16x96xf32>
    %37 = vector.extract_strided_slice %29 {offsets = [0, 0], sizes = [1, 8], strides = [1, 1]} : vector<2x8xf32> to vector<1x8xf32>
    %38 = vector.extract_strided_slice %36 {offsets = [0, 0], sizes = [8, 16], strides = [1, 1]} : vector<16x96xf32> to vector<8x16xf32>
    %39 = vector.extract_strided_slice %36 {offsets = [0, 32], sizes = [8, 16], strides = [1, 1]} : vector<16x96xf32> to vector<8x16xf32>
    %40 = vector.extract_strided_slice %36 {offsets = [0, 64], sizes = [8, 16], strides = [1, 1]} : vector<16x96xf32> to vector<8x16xf32>
    "tpu.trace_start"() <{level = 10 : i32, message = "qd,kd->qk"}> : () -> ()
    %cst_20 = arith.constant dense<0.000000e+00> : vector<8x8xf32>
    %41 = tpu.matmul %38, %39, %cst_20 {dimension_numbers = #tpu.dot_dimension_numbers<[1], [1], [0], [0], [0, 0, 1, 0], [], []>} : vector<8x16xf32>, vector<8x16xf32>, vector<8x8xf32> -> vector<8x8xf32>
    "tpu.trace_stop"() : () -> ()
    %cst_21 = arith.constant 2.500000e-01 : f32
    %42 = vector.broadcast %cst_21 : f32 to vector<8x8xf32>
    %43 = arith.mulf %41, %42 : vector<8x8xf32>
    %44 = vector.broadcast %37 : vector<1x8xf32> to vector<8x8xf32>
    %45 = arith.addf %43, %44 : vector<8x8xf32>
    %cst_22 = arith.constant dense<0xFF800000> : vector<8xf32>
    %46 = vector.multi_reduction <maximumf>, %45, %cst_22 [1] : vector<8x8xf32> to vector<8xf32>
    %47 = vector.shape_cast %46 : vector<8xf32> to vector<8x1xf32>
    %48 = vector.broadcast %47 : vector<8x1xf32> to vector<8x8xf32>
    %49 = arith.subf %45, %48 : vector<8x8xf32>
    %50 = math.exp %49 : vector<8x8xf32>
    %cst_23 = arith.constant dense<0.000000e+00> : vector<8xf32>
    %51 = vector.multi_reduction <add>, %50, %cst_23 [1] : vector<8x8xf32> to vector<8xf32>
    %52 = vector.shape_cast %51 : vector<8xf32> to vector<8x1xf32>
    %53 = tpu.reciprocal %52 {approx = true} : vector<8x1xf32> -> vector<8x1xf32>
    %54 = vector.broadcast %53 : vector<8x1xf32> to vector<8x8xf32>
    %55 = arith.mulf %50, %54 : vector<8x8xf32>
    %cst_24 = arith.constant dense<0.000000e+00> : vector<8x16xf32>
    %56 = tpu.matmul %55, %40, %cst_24 {dimension_numbers = #tpu.dot_dimension_numbers<[1], [0], [0], [1], [0, 0, 1, 1], [], []>} : vector<8x8xf32>, vector<8x16xf32>, vector<8x16xf32> -> vector<8x16xf32>
    %57 = vector.extract_strided_slice %36 {offsets = [0, 16], sizes = [8, 16], strides = [1, 1]} : vector<16x96xf32> to vector<8x16xf32>
    %58 = vector.extract_strided_slice %36 {offsets = [0, 48], sizes = [8, 16], strides = [1, 1]} : vector<16x96xf32> to vector<8x16xf32>
    %59 = vector.extract_strided_slice %36 {offsets = [0, 80], sizes = [8, 16], strides = [1, 1]} : vector<16x96xf32> to vector<8x16xf32>
    "tpu.trace_start"() <{level = 10 : i32, message = "qd,kd->qk"}> : () -> ()
    %cst_25 = arith.constant dense<0.000000e+00> : vector<8x8xf32>
    %60 = tpu.matmul %57, %58, %cst_25 {dimension_numbers = #tpu.dot_dimension_numbers<[1], [1], [0], [0], [0, 0, 1, 0], [], []>} : vector<8x16xf32>, vector<8x16xf32>, vector<8x8xf32> -> vector<8x8xf32>
    "tpu.trace_stop"() : () -> ()
    %cst_26 = arith.constant 2.500000e-01 : f32
    %61 = vector.broadcast %cst_26 : f32 to vector<8x8xf32>
    %62 = arith.mulf %60, %61 : vector<8x8xf32>
    %63 = vector.broadcast %37 : vector<1x8xf32> to vector<8x8xf32>
    %64 = arith.addf %62, %63 : vector<8x8xf32>
    %cst_27 = arith.constant dense<0xFF800000> : vector<8xf32>
    %65 = vector.multi_reduction <maximumf>, %64, %cst_27 [1] : vector<8x8xf32> to vector<8xf32>
    %66 = vector.shape_cast %65 : vector<8xf32> to vector<8x1xf32>
    %67 = vector.broadcast %66 : vector<8x1xf32> to vector<8x8xf32>
    %68 = arith.subf %64, %67 : vector<8x8xf32>
    %69 = math.exp %68 : vector<8x8xf32>
    %cst_28 = arith.constant dense<0.000000e+00> : vector<8xf32>
    %70 = vector.multi_reduction <add>, %69, %cst_28 [1] : vector<8x8xf32> to vector<8xf32>
    %71 = vector.shape_cast %70 : vector<8xf32> to vector<8x1xf32>
    %72 = tpu.reciprocal %71 {approx = true} : vector<8x1xf32> -> vector<8x1xf32>
    %73 = vector.broadcast %72 : vector<8x1xf32> to vector<8x8xf32>
    %74 = arith.mulf %69, %73 : vector<8x8xf32>
    %cst_29 = arith.constant dense<0.000000e+00> : vector<8x16xf32>
    %75 = tpu.matmul %74, %59, %cst_29 {dimension_numbers = #tpu.dot_dimension_numbers<[1], [0], [0], [1], [0, 0, 1, 1], [], []>} : vector<8x8xf32>, vector<8x16xf32>, vector<8x16xf32> -> vector<8x16xf32>
    %76 = tpu.concatenate %56, %75 in 1 : vector<8x16xf32>, vector<8x16xf32> -> vector<8x32xf32>
    %77 = vector.extract_strided_slice %29 {offsets = [1, 0], sizes = [1, 8], strides = [1, 1]} : vector<2x8xf32> to vector<1x8xf32>
    %78 = vector.extract_strided_slice %36 {offsets = [8, 0], sizes = [8, 16], strides = [1, 1]} : vector<16x96xf32> to vector<8x16xf32>
    %79 = vector.extract_strided_slice %36 {offsets = [8, 32], sizes = [8, 16], strides = [1, 1]} : vector<16x96xf32> to vector<8x16xf32>
    %80 = vector.extract_strided_slice %36 {offsets = [8, 64], sizes = [8, 16], strides = [1, 1]} : vector<16x96xf32> to vector<8x16xf32>
    "tpu.trace_start"() <{level = 10 : i32, message = "qd,kd->qk"}> : () -> ()
    %cst_30 = arith.constant dense<0.000000e+00> : vector<8x8xf32>
    %81 = tpu.matmul %78, %79, %cst_30 {dimension_numbers = #tpu.dot_dimension_numbers<[1], [1], [0], [0], [0, 0, 1, 0], [], []>} : vector<8x16xf32>, vector<8x16xf32>, vector<8x8xf32> -> vector<8x8xf32>
    "tpu.trace_stop"() : () -> ()
    %cst_31 = arith.constant 2.500000e-01 : f32
    %82 = vector.broadcast %cst_31 : f32 to vector<8x8xf32>
    %83 = arith.mulf %81, %82 : vector<8x8xf32>
    %84 = vector.broadcast %77 : vector<1x8xf32> to vector<8x8xf32>
    %85 = arith.addf %83, %84 : vector<8x8xf32>
    %cst_32 = arith.constant dense<0xFF800000> : vector<8xf32>
    %86 = vector.multi_reduction <maximumf>, %85, %cst_32 [1] : vector<8x8xf32> to vector<8xf32>
    %87 = vector.shape_cast %86 : vector<8xf32> to vector<8x1xf32>
    %88 = vector.broadcast %87 : vector<8x1xf32> to vector<8x8xf32>
    %89 = arith.subf %85, %88 : vector<8x8xf32>
    %90 = math.exp %89 : vector<8x8xf32>
    %cst_33 = arith.constant dense<0.000000e+00> : vector<8xf32>
    %91 = vector.multi_reduction <add>, %90, %cst_33 [1] : vector<8x8xf32> to vector<8xf32>
    %92 = vector.shape_cast %91 : vector<8xf32> to vector<8x1xf32>
    %93 = tpu.reciprocal %92 {approx = true} : vector<8x1xf32> -> vector<8x1xf32>
    %94 = vector.broadcast %93 : vector<8x1xf32> to vector<8x8xf32>
    %95 = arith.mulf %90, %94 : vector<8x8xf32>
    %cst_34 = arith.constant dense<0.000000e+00> : vector<8x16xf32>
    %96 = tpu.matmul %95, %80, %cst_34 {dimension_numbers = #tpu.dot_dimension_numbers<[1], [0], [0], [1], [0, 0, 1, 1], [], []>} : vector<8x8xf32>, vector<8x16xf32>, vector<8x16xf32> -> vector<8x16xf32>
    %97 = vector.extract_strided_slice %36 {offsets = [8, 16], sizes = [8, 16], strides = [1, 1]} : vector<16x96xf32> to vector<8x16xf32>
    %98 = vector.extract_strided_slice %36 {offsets = [8, 48], sizes = [8, 16], strides = [1, 1]} : vector<16x96xf32> to vector<8x16xf32>
    %99 = vector.extract_strided_slice %36 {offsets = [8, 80], sizes = [8, 16], strides = [1, 1]} : vector<16x96xf32> to vector<8x16xf32>
    "tpu.trace_start"() <{level = 10 : i32, message = "qd,kd->qk"}> : () -> ()
    %cst_35 = arith.constant dense<0.000000e+00> : vector<8x8xf32>
    %100 = tpu.matmul %97, %98, %cst_35 {dimension_numbers = #tpu.dot_dimension_numbers<[1], [1], [0], [0], [0, 0, 1, 0], [], []>} : vector<8x16xf32>, vector<8x16xf32>, vector<8x8xf32> -> vector<8x8xf32>
    "tpu.trace_stop"() : () -> ()
    %cst_36 = arith.constant 2.500000e-01 : f32
    %101 = vector.broadcast %cst_36 : f32 to vector<8x8xf32>
    %102 = arith.mulf %100, %101 : vector<8x8xf32>
    %103 = vector.broadcast %77 : vector<1x8xf32> to vector<8x8xf32>
    %104 = arith.addf %102, %103 : vector<8x8xf32>
    %cst_37 = arith.constant dense<0xFF800000> : vector<8xf32>
    %105 = vector.multi_reduction <maximumf>, %104, %cst_37 [1] : vector<8x8xf32> to vector<8xf32>
    %106 = vector.shape_cast %105 : vector<8xf32> to vector<8x1xf32>
    %107 = vector.broadcast %106 : vector<8x1xf32> to vector<8x8xf32>
    %108 = arith.subf %104, %107 : vector<8x8xf32>
    %109 = math.exp %108 : vector<8x8xf32>
    %cst_38 = arith.constant dense<0.000000e+00> : vector<8xf32>
    %110 = vector.multi_reduction <add>, %109, %cst_38 [1] : vector<8x8xf32> to vector<8xf32>
    %111 = vector.shape_cast %110 : vector<8xf32> to vector<8x1xf32>
    %112 = tpu.reciprocal %111 {approx = true} : vector<8x1xf32> -> vector<8x1xf32>
    %113 = vector.broadcast %112 : vector<8x1xf32> to vector<8x8xf32>
    %114 = arith.mulf %109, %113 : vector<8x8xf32>
    %cst_39 = arith.constant dense<0.000000e+00> : vector<8x16xf32>
    %115 = tpu.matmul %114, %99, %cst_39 {dimension_numbers = #tpu.dot_dimension_numbers<[1], [0], [0], [1], [0, 0, 1, 1], [], []>} : vector<8x8xf32>, vector<8x16xf32>, vector<8x16xf32> -> vector<8x16xf32>
    %116 = tpu.concatenate %96, %115 in 1 : vector<8x16xf32>, vector<8x16xf32> -> vector<8x32xf32>
    %117 = tpu.concatenate %76, %116 in 0 : vector<8x32xf32>, vector<8x32xf32> -> vector<16x32xf32>
    %c0_40 = arith.constant 0 : index
    %c0_41 = arith.constant 0 : index
    %c0_42 = arith.constant 0 : index
    %118 = vector.load %arg7[%c0_40, %c0_41, %c0_42] : memref<2x32x32xf32, #tpu.memory_space<vmem>>, vector<1x32x32xf32>
    %119 = vector.shape_cast %118 : vector<1x32x32xf32> to vector<32x32xf32>
    %cst_43 = arith.constant dense<0.000000e+00> : vector<16x32xf32>
    %120 = tpu.matmul %117, %119, %cst_43 {dimension_numbers = #tpu.dot_dimension_numbers<[1], [0], [0], [1], [0, 0, 1, 1], [], []>} : vector<16x32xf32>, vector<32x32xf32>, vector<16x32xf32> -> vector<16x32xf32>
    %c0_44 = arith.constant 0 : index
    %c0_45 = arith.constant 0 : index
    %c0_46 = arith.constant 0 : index
    %121 = vector.load %arg8[%c0_44, %c0_45, %c0_46] : memref<2x1x32xf32, #tpu.memory_space<vmem>>, vector<1x1x32xf32>
    %122 = vector.shape_cast %121 : vector<1x1x32xf32> to vector<1x32xf32>
    %123 = vector.broadcast %122 : vector<1x32xf32> to vector<16x32xf32>
    %124 = arith.addf %120, %123 : vector<16x32xf32>
    %125 = arith.addf %124, %24 : vector<16x32xf32>
    %c0_47 = arith.constant 0 : index
    %c0_48 = arith.constant 0 : index
    %c0_49 = arith.constant 0 : index
    %126 = vector.load %arg9[%c0_47, %c0_48, %c0_49] : memref<2x1x32xf32, #tpu.memory_space<vmem>>, vector<1x1x32xf32>
    %127 = vector.shape_cast %126 : vector<1x1x32xf32> to vector<1x32xf32>
    %c0_50 = arith.constant 0 : index
    %c0_51 = arith.constant 0 : index
    %c0_52 = arith.constant 0 : index
    %128 = vector.load %arg10[%c0_50, %c0_51, %c0_52] : memref<2x1x32xf32, #tpu.memory_space<vmem>>, vector<1x1x32xf32>
    %129 = vector.shape_cast %128 : vector<1x1x32xf32> to vector<1x32xf32>
    %cst_53 = arith.constant dense<0.000000e+00> : vector<16xf32>
    %130 = vector.multi_reduction <add>, %125, %cst_53 [1] : vector<16x32xf32> to vector<16xf32>
    %131 = vector.shape_cast %130 : vector<16xf32> to vector<16x1xf32>
    %cst_54 = arith.constant 3.200000e+01 : f32
    %132 = vector.broadcast %cst_54 : f32 to vector<16x1xf32>
    %133 = arith.divf %131, %132 : vector<16x1xf32>
    %134 = vector.broadcast %133 : vector<16x1xf32> to vector<16x32xf32>
    %135 = arith.subf %125, %134 : vector<16x32xf32>
    %136 = arith.mulf %135, %135 : vector<16x32xf32>
    %cst_55 = arith.constant dense<0.000000e+00> : vector<16xf32>
    %137 = vector.multi_reduction <add>, %136, %cst_55 [1] : vector<16x32xf32> to vector<16xf32>
    %138 = vector.shape_cast %137 : vector<16xf32> to vector<16x1xf32>
    %cst_56 = arith.constant 3.200000e+01 : f32
    %139 = vector.broadcast %cst_56 : f32 to vector<16x1xf32>
    %140 = arith.divf %138, %139 : vector<16x1xf32>
    %141 = vector.broadcast %133 : vector<16x1xf32> to vector<16x32xf32>
    %142 = arith.subf %125, %141 : vector<16x32xf32>
    %cst_57 = arith.constant 9.99999996E-13 : f32
    %143 = vector.broadcast %cst_57 : f32 to vector<16x1xf32>
    %144 = arith.addf %140, %143 : vector<16x1xf32>
    %145 = math.rsqrt %144 : vector<16x1xf32>
    %146 = vector.broadcast %145 : vector<16x1xf32> to vector<16x32xf32>
    %147 = arith.mulf %142, %146 : vector<16x32xf32>
    %148 = vector.broadcast %127 : vector<1x32xf32> to vector<16x32xf32>
    %149 = arith.mulf %147, %148 : vector<16x32xf32>
    %150 = vector.broadcast %129 : vector<1x32xf32> to vector<16x32xf32>
    %151 = arith.addf %149, %150 : vector<16x32xf32>
    %c0_58 = arith.constant 0 : index
    %c0_59 = arith.constant 0 : index
    %c0_60 = arith.constant 0 : index
    %152 = vector.load %arg11[%c0_58, %c0_59, %c0_60] : memref<2x32x64xf32, #tpu.memory_space<vmem>>, vector<1x32x64xf32>
    %153 = vector.shape_cast %152 : vector<1x32x64xf32> to vector<32x64xf32>
    %cst_61 = arith.constant dense<0.000000e+00> : vector<16x64xf32>
    %154 = tpu.matmul %151, %153, %cst_61 {dimension_numbers = #tpu.dot_dimension_numbers<[1], [0], [0], [1], [0, 0, 1, 1], [], []>} : vector<16x32xf32>, vector<32x64xf32>, vector<16x64xf32> -> vector<16x64xf32>
    %c0_62 = arith.constant 0 : index
    %c0_63 = arith.constant 0 : index
    %c0_64 = arith.constant 0 : index
    %155 = vector.load %arg12[%c0_62, %c0_63, %c0_64] : memref<2x1x64xf32, #tpu.memory_space<vmem>>, vector<1x1x64xf32>
    %156 = vector.shape_cast %155 : vector<1x1x64xf32> to vector<1x64xf32>
    %157 = vector.broadcast %156 : vector<1x64xf32> to vector<16x64xf32>
    %158 = arith.addf %154, %157 : vector<16x64xf32>
    %cst_65 = arith.constant 5.000000e-01 : f32
    %159 = vector.broadcast %cst_65 : f32 to vector<16x64xf32>
    %160 = arith.mulf %159, %158 : vector<16x64xf32>
    %cst_66 = arith.constant 4.471500e-02 : f32
    %161 = vector.broadcast %cst_66 : f32 to vector<16x64xf32>
    %162 = arith.mulf %161, %158 : vector<16x64xf32>
    %163 = arith.mulf %162, %158 : vector<16x64xf32>
    %164 = arith.mulf %163, %158 : vector<16x64xf32>
    %165 = arith.addf %158, %164 : vector<16x64xf32>
    %cst_67 = arith.constant 0.797884583 : f32
    %166 = vector.broadcast %cst_67 : f32 to vector<16x64xf32>
    %167 = arith.mulf %166, %165 : vector<16x64xf32>
    %168 = math.tanh %167 : vector<16x64xf32>
    %cst_68 = arith.constant 1.000000e+00 : f32
    %169 = vector.broadcast %cst_68 : f32 to vector<16x64xf32>
    %170 = arith.addf %169, %168 : vector<16x64xf32>
    %171 = arith.mulf %160, %170 : vector<16x64xf32>
    %c0_69 = arith.constant 0 : index
    %c0_70 = arith.constant 0 : index
    %c0_71 = arith.constant 0 : index
    %172 = vector.load %arg13[%c0_69, %c0_70, %c0_71] : memref<2x64x32xf32, #tpu.memory_space<vmem>>, vector<1x64x32xf32>
    %173 = vector.shape_cast %172 : vector<1x64x32xf32> to vector<64x32xf32>
    %cst_72 = arith.constant dense<0.000000e+00> : vector<16x32xf32>
    %174 = tpu.matmul %171, %173, %cst_72 {dimension_numbers = #tpu.dot_dimension_numbers<[1], [0], [0], [1], [0, 0, 1, 1], [], []>} : vector<16x64xf32>, vector<64x32xf32>, vector<16x32xf32> -> vector<16x32xf32>
    %c0_73 = arith.constant 0 : index
    %c0_74 = arith.constant 0 : index
    %c0_75 = arith.constant 0 : index
    %175 = vector.load %arg14[%c0_73, %c0_74, %c0_75] : memref<2x1x32xf32, #tpu.memory_space<vmem>>, vector<1x1x32xf32>
    %176 = vector.shape_cast %175 : vector<1x1x32xf32> to vector<1x32xf32>
    %177 = vector.broadcast %176 : vector<1x32xf32> to vector<16x32xf32>
    %178 = arith.addf %174, %177 : vector<16x32xf32>
    %179 = arith.addf %178, %151 : vector<16x32xf32>
    %c0_76 = arith.constant 0 : index
    %c0_77 = arith.constant 0 : index
    %c0_78 = arith.constant 0 : index
    %180 = vector.load %arg15[%c0_76, %c0_77, %c0_78] : memref<2x1x32xf32, #tpu.memory_space<vmem>>, vector<1x1x32xf32>
    %181 = vector.shape_cast %180 : vector<1x1x32xf32> to vector<1x32xf32>
    %c0_79 = arith.constant 0 : index
    %c0_80 = arith.constant 0 : index
    %c0_81 = arith.constant 0 : index
    %182 = vector.load %arg16[%c0_79, %c0_80, %c0_81] : memref<2x1x32xf32, #tpu.memory_space<vmem>>, vector<1x1x32xf32>
    %183 = vector.shape_cast %182 : vector<1x1x32xf32> to vector<1x32xf32>
    %cst_82 = arith.constant dense<0.000000e+00> : vector<16xf32>
    %184 = vector.multi_reduction <add>, %179, %cst_82 [1] : vector<16x32xf32> to vector<16xf32>
    %185 = vector.shape_cast %184 : vector<16xf32> to vector<16x1xf32>
    %cst_83 = arith.constant 3.200000e+01 : f32
    %186 = vector.broadcast %cst_83 : f32 to vector<16x1xf32>
    %187 = arith.divf %185, %186 : vector<16x1xf32>
    %188 = vector.broadcast %187 : vector<16x1xf32> to vector<16x32xf32>
    %189 = arith.subf %179, %188 : vector<16x32xf32>
    %190 = arith.mulf %189, %189 : vector<16x32xf32>
    %cst_84 = arith.constant dense<0.000000e+00> : vector<16xf32>
    %191 = vector.multi_reduction <add>, %190, %cst_84 [1] : vector<16x32xf32> to vector<16xf32>
    %192 = vector.shape_cast %191 : vector<16xf32> to vector<16x1xf32>
    %cst_85 = arith.constant 3.200000e+01 : f32
    %193 = vector.broadcast %cst_85 : f32 to vector<16x1xf32>
    %194 = arith.divf %192, %193 : vector<16x1xf32>
    %195 = vector.broadcast %187 : vector<16x1xf32> to vector<16x32xf32>
    %196 = arith.subf %179, %195 : vector<16x32xf32>
    %cst_86 = arith.constant 9.99999996E-13 : f32
    %197 = vector.broadcast %cst_86 : f32 to vector<16x1xf32>
    %198 = arith.addf %194, %197 : vector<16x1xf32>
    %199 = math.rsqrt %198 : vector<16x1xf32>
    %200 = vector.broadcast %199 : vector<16x1xf32> to vector<16x32xf32>
    %201 = arith.mulf %196, %200 : vector<16x32xf32>
    %202 = vector.broadcast %181 : vector<1x32xf32> to vector<16x32xf32>
    %203 = arith.mulf %201, %202 : vector<16x32xf32>
    %204 = vector.broadcast %183 : vector<1x32xf32> to vector<16x32xf32>
    %205 = arith.addf %203, %204 : vector<16x32xf32>
    %c1 = arith.constant 1 : index
    %c0_87 = arith.constant 0 : index
    %c0_88 = arith.constant 0 : index
    %206 = vector.load %arg5[%c1, %c0_87, %c0_88] : memref<2x32x96xf32, #tpu.memory_space<vmem>>, vector<1x32x96xf32>
    %207 = vector.shape_cast %206 : vector<1x32x96xf32> to vector<32x96xf32>
    %cst_89 = arith.constant dense<0.000000e+00> : vector<16x96xf32>
    %208 = tpu.matmul %205, %207, %cst_89 {dimension_numbers = #tpu.dot_dimension_numbers<[1], [0], [0], [1], [0, 0, 1, 1], [], []>} : vector<16x32xf32>, vector<32x96xf32>, vector<16x96xf32> -> vector<16x96xf32>
    %c1_90 = arith.constant 1 : index
    %c0_91 = arith.constant 0 : index
    %c0_92 = arith.constant 0 : index
    %209 = vector.load %arg6[%c1_90, %c0_91, %c0_92] : memref<2x1x96xf32, #tpu.memory_space<vmem>>, vector<1x1x96xf32>
    %210 = vector.shape_cast %209 : vector<1x1x96xf32> to vector<1x96xf32>
    %211 = vector.broadcast %210 : vector<1x96xf32> to vector<16x96xf32>
    %212 = arith.addf %208, %211 : vector<16x96xf32>
    %213 = vector.extract_strided_slice %29 {offsets = [0, 0], sizes = [1, 8], strides = [1, 1]} : vector<2x8xf32> to vector<1x8xf32>
    %214 = vector.extract_strided_slice %212 {offsets = [0, 0], sizes = [8, 16], strides = [1, 1]} : vector<16x96xf32> to vector<8x16xf32>
    %215 = vector.extract_strided_slice %212 {offsets = [0, 32], sizes = [8, 16], strides = [1, 1]} : vector<16x96xf32> to vector<8x16xf32>
    %216 = vector.extract_strided_slice %212 {offsets = [0, 64], sizes = [8, 16], strides = [1, 1]} : vector<16x96xf32> to vector<8x16xf32>
    "tpu.trace_start"() <{level = 10 : i32, message = "qd,kd->qk"}> : () -> ()
    %cst_93 = arith.constant dense<0.000000e+00> : vector<8x8xf32>
    %217 = tpu.matmul %214, %215, %cst_93 {dimension_numbers = #tpu.dot_dimension_numbers<[1], [1], [0], [0], [0, 0, 1, 0], [], []>} : vector<8x16xf32>, vector<8x16xf32>, vector<8x8xf32> -> vector<8x8xf32>
    "tpu.trace_stop"() : () -> ()
    %cst_94 = arith.constant 2.500000e-01 : f32
    %218 = vector.broadcast %cst_94 : f32 to vector<8x8xf32>
    %219 = arith.mulf %217, %218 : vector<8x8xf32>
    %220 = vector.broadcast %213 : vector<1x8xf32> to vector<8x8xf32>
    %221 = arith.addf %219, %220 : vector<8x8xf32>
    %cst_95 = arith.constant dense<0xFF800000> : vector<8xf32>
    %222 = vector.multi_reduction <maximumf>, %221, %cst_95 [1] : vector<8x8xf32> to vector<8xf32>
    %223 = vector.shape_cast %222 : vector<8xf32> to vector<8x1xf32>
    %224 = vector.broadcast %223 : vector<8x1xf32> to vector<8x8xf32>
    %225 = arith.subf %221, %224 : vector<8x8xf32>
    %226 = math.exp %225 : vector<8x8xf32>
    %cst_96 = arith.constant dense<0.000000e+00> : vector<8xf32>
    %227 = vector.multi_reduction <add>, %226, %cst_96 [1] : vector<8x8xf32> to vector<8xf32>
    %228 = vector.shape_cast %227 : vector<8xf32> to vector<8x1xf32>
    %229 = tpu.reciprocal %228 {approx = true} : vector<8x1xf32> -> vector<8x1xf32>
    %230 = vector.broadcast %229 : vector<8x1xf32> to vector<8x8xf32>
    %231 = arith.mulf %226, %230 : vector<8x8xf32>
    %cst_97 = arith.constant dense<0.000000e+00> : vector<8x16xf32>
    %232 = tpu.matmul %231, %216, %cst_97 {dimension_numbers = #tpu.dot_dimension_numbers<[1], [0], [0], [1], [0, 0, 1, 1], [], []>} : vector<8x8xf32>, vector<8x16xf32>, vector<8x16xf32> -> vector<8x16xf32>
    %233 = vector.extract_strided_slice %212 {offsets = [0, 16], sizes = [8, 16], strides = [1, 1]} : vector<16x96xf32> to vector<8x16xf32>
    %234 = vector.extract_strided_slice %212 {offsets = [0, 48], sizes = [8, 16], strides = [1, 1]} : vector<16x96xf32> to vector<8x16xf32>
    %235 = vector.extract_strided_slice %212 {offsets = [0, 80], sizes = [8, 16], strides = [1, 1]} : vector<16x96xf32> to vector<8x16xf32>
    "tpu.trace_start"() <{level = 10 : i32, message = "qd,kd->qk"}> : () -> ()
    %cst_98 = arith.constant dense<0.000000e+00> : vector<8x8xf32>
    %236 = tpu.matmul %233, %234, %cst_98 {dimension_numbers = #tpu.dot_dimension_numbers<[1], [1], [0], [0], [0, 0, 1, 0], [], []>} : vector<8x16xf32>, vector<8x16xf32>, vector<8x8xf32> -> vector<8x8xf32>
    "tpu.trace_stop"() : () -> ()
    %cst_99 = arith.constant 2.500000e-01 : f32
    %237 = vector.broadcast %cst_99 : f32 to vector<8x8xf32>
    %238 = arith.mulf %236, %237 : vector<8x8xf32>
    %239 = vector.broadcast %213 : vector<1x8xf32> to vector<8x8xf32>
    %240 = arith.addf %238, %239 : vector<8x8xf32>
    %cst_100 = arith.constant dense<0xFF800000> : vector<8xf32>
    %241 = vector.multi_reduction <maximumf>, %240, %cst_100 [1] : vector<8x8xf32> to vector<8xf32>
    %242 = vector.shape_cast %241 : vector<8xf32> to vector<8x1xf32>
    %243 = vector.broadcast %242 : vector<8x1xf32> to vector<8x8xf32>
    %244 = arith.subf %240, %243 : vector<8x8xf32>
    %245 = math.exp %244 : vector<8x8xf32>
    %cst_101 = arith.constant dense<0.000000e+00> : vector<8xf32>
    %246 = vector.multi_reduction <add>, %245, %cst_101 [1] : vector<8x8xf32> to vector<8xf32>
    %247 = vector.shape_cast %246 : vector<8xf32> to vector<8x1xf32>
    %248 = tpu.reciprocal %247 {approx = true} : vector<8x1xf32> -> vector<8x1xf32>
    %249 = vector.broadcast %248 : vector<8x1xf32> to vector<8x8xf32>
    %250 = arith.mulf %245, %249 : vector<8x8xf32>
    %cst_102 = arith.constant dense<0.000000e+00> : vector<8x16xf32>
    %251 = tpu.matmul %250, %235, %cst_102 {dimension_numbers = #tpu.dot_dimension_numbers<[1], [0], [0], [1], [0, 0, 1, 1], [], []>} : vector<8x8xf32>, vector<8x16xf32>, vector<8x16xf32> -> vector<8x16xf32>
    %252 = tpu.concatenate %232, %251 in 1 : vector<8x16xf32>, vector<8x16xf32> -> vector<8x32xf32>
    %253 = vector.extract_strided_slice %29 {offsets = [1, 0], sizes = [1, 8], strides = [1, 1]} : vector<2x8xf32> to vector<1x8xf32>
    %254 = vector.extract_strided_slice %212 {offsets = [8, 0], sizes = [8, 16], strides = [1, 1]} : vector<16x96xf32> to vector<8x16xf32>
    %255 = vector.extract_strided_slice %212 {offsets = [8, 32], sizes = [8, 16], strides = [1, 1]} : vector<16x96xf32> to vector<8x16xf32>
    %256 = vector.extract_strided_slice %212 {offsets = [8, 64], sizes = [8, 16], strides = [1, 1]} : vector<16x96xf32> to vector<8x16xf32>
    "tpu.trace_start"() <{level = 10 : i32, message = "qd,kd->qk"}> : () -> ()
    %cst_103 = arith.constant dense<0.000000e+00> : vector<8x8xf32>
    %257 = tpu.matmul %254, %255, %cst_103 {dimension_numbers = #tpu.dot_dimension_numbers<[1], [1], [0], [0], [0, 0, 1, 0], [], []>} : vector<8x16xf32>, vector<8x16xf32>, vector<8x8xf32> -> vector<8x8xf32>
    "tpu.trace_stop"() : () -> ()
    %cst_104 = arith.constant 2.500000e-01 : f32
    %258 = vector.broadcast %cst_104 : f32 to vector<8x8xf32>
    %259 = arith.mulf %257, %258 : vector<8x8xf32>
    %260 = vector.broadcast %253 : vector<1x8xf32> to vector<8x8xf32>
    %261 = arith.addf %259, %260 : vector<8x8xf32>
    %cst_105 = arith.constant dense<0xFF800000> : vector<8xf32>
    %262 = vector.multi_reduction <maximumf>, %261, %cst_105 [1] : vector<8x8xf32> to vector<8xf32>
    %263 = vector.shape_cast %262 : vector<8xf32> to vector<8x1xf32>
    %264 = vector.broadcast %263 : vector<8x1xf32> to vector<8x8xf32>
    %265 = arith.subf %261, %264 : vector<8x8xf32>
    %266 = math.exp %265 : vector<8x8xf32>
    %cst_106 = arith.constant dense<0.000000e+00> : vector<8xf32>
    %267 = vector.multi_reduction <add>, %266, %cst_106 [1] : vector<8x8xf32> to vector<8xf32>
    %268 = vector.shape_cast %267 : vector<8xf32> to vector<8x1xf32>
    %269 = tpu.reciprocal %268 {approx = true} : vector<8x1xf32> -> vector<8x1xf32>
    %270 = vector.broadcast %269 : vector<8x1xf32> to vector<8x8xf32>
    %271 = arith.mulf %266, %270 : vector<8x8xf32>
    %cst_107 = arith.constant dense<0.000000e+00> : vector<8x16xf32>
    %272 = tpu.matmul %271, %256, %cst_107 {dimension_numbers = #tpu.dot_dimension_numbers<[1], [0], [0], [1], [0, 0, 1, 1], [], []>} : vector<8x8xf32>, vector<8x16xf32>, vector<8x16xf32> -> vector<8x16xf32>
    %273 = vector.extract_strided_slice %212 {offsets = [8, 16], sizes = [8, 16], strides = [1, 1]} : vector<16x96xf32> to vector<8x16xf32>
    %274 = vector.extract_strided_slice %212 {offsets = [8, 48], sizes = [8, 16], strides = [1, 1]} : vector<16x96xf32> to vector<8x16xf32>
    %275 = vector.extract_strided_slice %212 {offsets = [8, 80], sizes = [8, 16], strides = [1, 1]} : vector<16x96xf32> to vector<8x16xf32>
    "tpu.trace_start"() <{level = 10 : i32, message = "qd,kd->qk"}> : () -> ()
    %cst_108 = arith.constant dense<0.000000e+00> : vector<8x8xf32>
    %276 = tpu.matmul %273, %274, %cst_108 {dimension_numbers = #tpu.dot_dimension_numbers<[1], [1], [0], [0], [0, 0, 1, 0], [], []>} : vector<8x16xf32>, vector<8x16xf32>, vector<8x8xf32> -> vector<8x8xf32>
    "tpu.trace_stop"() : () -> ()
    %cst_109 = arith.constant 2.500000e-01 : f32
    %277 = vector.broadcast %cst_109 : f32 to vector<8x8xf32>
    %278 = arith.mulf %276, %277 : vector<8x8xf32>
    %279 = vector.broadcast %253 : vector<1x8xf32> to vector<8x8xf32>
    %280 = arith.addf %278, %279 : vector<8x8xf32>
    %cst_110 = arith.constant dense<0xFF800000> : vector<8xf32>
    %281 = vector.multi_reduction <maximumf>, %280, %cst_110 [1] : vector<8x8xf32> to vector<8xf32>
    %282 = vector.shape_cast %281 : vector<8xf32> to vector<8x1xf32>
    %283 = vector.broadcast %282 : vector<8x1xf32> to vector<8x8xf32>
    %284 = arith.subf %280, %283 : vector<8x8xf32>
    %285 = math.exp %284 : vector<8x8xf32>
    %cst_111 = arith.constant dense<0.000000e+00> : vector<8xf32>
    %286 = vector.multi_reduction <add>, %285, %cst_111 [1] : vector<8x8xf32> to vector<8xf32>
    %287 = vector.shape_cast %286 : vector<8xf32> to vector<8x1xf32>
    %288 = tpu.reciprocal %287 {approx = true} : vector<8x1xf32> -> vector<8x1xf32>
    %289 = vector.broadcast %288 : vector<8x1xf32> to vector<8x8xf32>
    %290 = arith.mulf %285, %289 : vector<8x8xf32>
    %cst_112 = arith.constant dense<0.000000e+00> : vector<8x16xf32>
    %291 = tpu.matmul %290, %275, %cst_112 {dimension_numbers = #tpu.dot_dimension_numbers<[1], [0], [0], [1], [0, 0, 1, 1], [], []>} : vector<8x8xf32>, vector<8x16xf32>, vector<8x16xf32> -> vector<8x16xf32>
    %292 = tpu.concatenate %272, %291 in 1 : vector<8x16xf32>, vector<8x16xf32> -> vector<8x32xf32>
    %293 = tpu.concatenate %252, %292 in 0 : vector<8x32xf32>, vector<8x32xf32> -> vector<16x32xf32>
    %c1_113 = arith.constant 1 : index
    %c0_114 = arith.constant 0 : index
    %c0_115 = arith.constant 0 : index
    %294 = vector.load %arg7[%c1_113, %c0_114, %c0_115] : memref<2x32x32xf32, #tpu.memory_space<vmem>>, vector<1x32x32xf32>
    %295 = vector.shape_cast %294 : vector<1x32x32xf32> to vector<32x32xf32>
    %cst_116 = arith.constant dense<0.000000e+00> : vector<16x32xf32>
    %296 = tpu.matmul %293, %295, %cst_116 {dimension_numbers = #tpu.dot_dimension_numbers<[1], [0], [0], [1], [0, 0, 1, 1], [], []>} : vector<16x32xf32>, vector<32x32xf32>, vector<16x32xf32> -> vector<16x32xf32>
    %c1_117 = arith.constant 1 : index
    %c0_118 = arith.constant 0 : index
    %c0_119 = arith.constant 0 : index
    %297 = vector.load %arg8[%c1_117, %c0_118, %c0_119] : memref<2x1x32xf32, #tpu.memory_space<vmem>>, vector<1x1x32xf32>
    %298 = vector.shape_cast %297 : vector<1x1x32xf32> to vector<1x32xf32>
    %299 = vector.broadcast %298 : vector<1x32xf32> to vector<16x32xf32>
    %300 = arith.addf %296, %299 : vector<16x32xf32>
    %301 = arith.addf %300, %205 : vector<16x32xf32>
    %c1_120 = arith.constant 1 : index
    %c0_121 = arith.constant 0 : index
    %c0_122 = arith.constant 0 : index
    %302 = vector.load %arg9[%c1_120, %c0_121, %c0_122] : memref<2x1x32xf32, #tpu.memory_space<vmem>>, vector<1x1x32xf32>
    %303 = vector.shape_cast %302 : vector<1x1x32xf32> to vector<1x32xf32>
    %c1_123 = arith.constant 1 : index
    %c0_124 = arith.constant 0 : index
    %c0_125 = arith.constant 0 : index
    %304 = vector.load %arg10[%c1_123, %c0_124, %c0_125] : memref<2x1x32xf32, #tpu.memory_space<vmem>>, vector<1x1x32xf32>
    %305 = vector.shape_cast %304 : vector<1x1x32xf32> to vector<1x32xf32>
    %cst_126 = arith.constant dense<0.000000e+00> : vector<16xf32>
    %306 = vector.multi_reduction <add>, %301, %cst_126 [1] : vector<16x32xf32> to vector<16xf32>
    %307 = vector.shape_cast %306 : vector<16xf32> to vector<16x1xf32>
    %cst_127 = arith.constant 3.200000e+01 : f32
    %308 = vector.broadcast %cst_127 : f32 to vector<16x1xf32>
    %309 = arith.divf %307, %308 : vector<16x1xf32>
    %310 = vector.broadcast %309 : vector<16x1xf32> to vector<16x32xf32>
    %311 = arith.subf %301, %310 : vector<16x32xf32>
    %312 = arith.mulf %311, %311 : vector<16x32xf32>
    %cst_128 = arith.constant dense<0.000000e+00> : vector<16xf32>
    %313 = vector.multi_reduction <add>, %312, %cst_128 [1] : vector<16x32xf32> to vector<16xf32>
    %314 = vector.shape_cast %313 : vector<16xf32> to vector<16x1xf32>
    %cst_129 = arith.constant 3.200000e+01 : f32
    %315 = vector.broadcast %cst_129 : f32 to vector<16x1xf32>
    %316 = arith.divf %314, %315 : vector<16x1xf32>
    %317 = vector.broadcast %309 : vector<16x1xf32> to vector<16x32xf32>
    %318 = arith.subf %301, %317 : vector<16x32xf32>
    %cst_130 = arith.constant 9.99999996E-13 : f32
    %319 = vector.broadcast %cst_130 : f32 to vector<16x1xf32>
    %320 = arith.addf %316, %319 : vector<16x1xf32>
    %321 = math.rsqrt %320 : vector<16x1xf32>
    %322 = vector.broadcast %321 : vector<16x1xf32> to vector<16x32xf32>
    %323 = arith.mulf %318, %322 : vector<16x32xf32>
    %324 = vector.broadcast %303 : vector<1x32xf32> to vector<16x32xf32>
    %325 = arith.mulf %323, %324 : vector<16x32xf32>
    %326 = vector.broadcast %305 : vector<1x32xf32> to vector<16x32xf32>
    %327 = arith.addf %325, %326 : vector<16x32xf32>
    %c1_131 = arith.constant 1 : index
    %c0_132 = arith.constant 0 : index
    %c0_133 = arith.constant 0 : index
    %328 = vector.load %arg11[%c1_131, %c0_132, %c0_133] : memref<2x32x64xf32, #tpu.memory_space<vmem>>, vector<1x32x64xf32>
    %329 = vector.shape_cast %328 : vector<1x32x64xf32> to vector<32x64xf32>
    %cst_134 = arith.constant dense<0.000000e+00> : vector<16x64xf32>
    %330 = tpu.matmul %327, %329, %cst_134 {dimension_numbers = #tpu.dot_dimension_numbers<[1], [0], [0], [1], [0, 0, 1, 1], [], []>} : vector<16x32xf32>, vector<32x64xf32>, vector<16x64xf32> -> vector<16x64xf32>
    %c1_135 = arith.constant 1 : index
    %c0_136 = arith.constant 0 : index
    %c0_137 = arith.constant 0 : index
    %331 = vector.load %arg12[%c1_135, %c0_136, %c0_137] : memref<2x1x64xf32, #tpu.memory_space<vmem>>, vector<1x1x64xf32>
    %332 = vector.shape_cast %331 : vector<1x1x64xf32> to vector<1x64xf32>
    %333 = vector.broadcast %332 : vector<1x64xf32> to vector<16x64xf32>
    %334 = arith.addf %330, %333 : vector<16x64xf32>
    %cst_138 = arith.constant 5.000000e-01 : f32
    %335 = vector.broadcast %cst_138 : f32 to vector<16x64xf32>
    %336 = arith.mulf %335, %334 : vector<16x64xf32>
    %cst_139 = arith.constant 4.471500e-02 : f32
    %337 = vector.broadcast %cst_139 : f32 to vector<16x64xf32>
    %338 = arith.mulf %337, %334 : vector<16x64xf32>
    %339 = arith.mulf %338, %334 : vector<16x64xf32>
    %340 = arith.mulf %339, %334 : vector<16x64xf32>
    %341 = arith.addf %334, %340 : vector<16x64xf32>
    %cst_140 = arith.constant 0.797884583 : f32
    %342 = vector.broadcast %cst_140 : f32 to vector<16x64xf32>
    %343 = arith.mulf %342, %341 : vector<16x64xf32>
    %344 = math.tanh %343 : vector<16x64xf32>
    %cst_141 = arith.constant 1.000000e+00 : f32
    %345 = vector.broadcast %cst_141 : f32 to vector<16x64xf32>
    %346 = arith.addf %345, %344 : vector<16x64xf32>
    %347 = arith.mulf %336, %346 : vector<16x64xf32>
    %c1_142 = arith.constant 1 : index
    %c0_143 = arith.constant 0 : index
    %c0_144 = arith.constant 0 : index
    %348 = vector.load %arg13[%c1_142, %c0_143, %c0_144] : memref<2x64x32xf32, #tpu.memory_space<vmem>>, vector<1x64x32xf32>
    %349 = vector.shape_cast %348 : vector<1x64x32xf32> to vector<64x32xf32>
    %cst_145 = arith.constant dense<0.000000e+00> : vector<16x32xf32>
    %350 = tpu.matmul %347, %349, %cst_145 {dimension_numbers = #tpu.dot_dimension_numbers<[1], [0], [0], [1], [0, 0, 1, 1], [], []>} : vector<16x64xf32>, vector<64x32xf32>, vector<16x32xf32> -> vector<16x32xf32>
    %c1_146 = arith.constant 1 : index
    %c0_147 = arith.constant 0 : index
    %c0_148 = arith.constant 0 : index
    %351 = vector.load %arg14[%c1_146, %c0_147, %c0_148] : memref<2x1x32xf32, #tpu.memory_space<vmem>>, vector<1x1x32xf32>
    %352 = vector.shape_cast %351 : vector<1x1x32xf32> to vector<1x32xf32>
    %353 = vector.broadcast %352 : vector<1x32xf32> to vector<16x32xf32>
    %354 = arith.addf %350, %353 : vector<16x32xf32>
    %355 = arith.addf %354, %327 : vector<16x32xf32>
    %c1_149 = arith.constant 1 : index
    %c0_150 = arith.constant 0 : index
    %c0_151 = arith.constant 0 : index
    %356 = vector.load %arg15[%c1_149, %c0_150, %c0_151] : memref<2x1x32xf32, #tpu.memory_space<vmem>>, vector<1x1x32xf32>
    %357 = vector.shape_cast %356 : vector<1x1x32xf32> to vector<1x32xf32>
    %c1_152 = arith.constant 1 : index
    %c0_153 = arith.constant 0 : index
    %c0_154 = arith.constant 0 : index
    %358 = vector.load %arg16[%c1_152, %c0_153, %c0_154] : memref<2x1x32xf32, #tpu.memory_space<vmem>>, vector<1x1x32xf32>
    %359 = vector.shape_cast %358 : vector<1x1x32xf32> to vector<1x32xf32>
    %cst_155 = arith.constant dense<0.000000e+00> : vector<16xf32>
    %360 = vector.multi_reduction <add>, %355, %cst_155 [1] : vector<16x32xf32> to vector<16xf32>
    %361 = vector.shape_cast %360 : vector<16xf32> to vector<16x1xf32>
    %cst_156 = arith.constant 3.200000e+01 : f32
    %362 = vector.broadcast %cst_156 : f32 to vector<16x1xf32>
    %363 = arith.divf %361, %362 : vector<16x1xf32>
    %364 = vector.broadcast %363 : vector<16x1xf32> to vector<16x32xf32>
    %365 = arith.subf %355, %364 : vector<16x32xf32>
    %366 = arith.mulf %365, %365 : vector<16x32xf32>
    %cst_157 = arith.constant dense<0.000000e+00> : vector<16xf32>
    %367 = vector.multi_reduction <add>, %366, %cst_157 [1] : vector<16x32xf32> to vector<16xf32>
    %368 = vector.shape_cast %367 : vector<16xf32> to vector<16x1xf32>
    %cst_158 = arith.constant 3.200000e+01 : f32
    %369 = vector.broadcast %cst_158 : f32 to vector<16x1xf32>
    %370 = arith.divf %368, %369 : vector<16x1xf32>
    %371 = vector.broadcast %363 : vector<16x1xf32> to vector<16x32xf32>
    %372 = arith.subf %355, %371 : vector<16x32xf32>
    %cst_159 = arith.constant 9.99999996E-13 : f32
    %373 = vector.broadcast %cst_159 : f32 to vector<16x1xf32>
    %374 = arith.addf %370, %373 : vector<16x1xf32>
    %375 = math.rsqrt %374 : vector<16x1xf32>
    %376 = vector.broadcast %375 : vector<16x1xf32> to vector<16x32xf32>
    %377 = arith.mulf %372, %376 : vector<16x32xf32>
    %378 = vector.broadcast %357 : vector<1x32xf32> to vector<16x32xf32>
    %379 = arith.mulf %377, %378 : vector<16x32xf32>
    %380 = vector.broadcast %359 : vector<1x32xf32> to vector<16x32xf32>
    %381 = arith.addf %379, %380 : vector<16x32xf32>
    %382 = vector.extract_strided_slice %381 {offsets = [0, 0], sizes = [1, 32], strides = [1, 1]} : vector<16x32xf32> to vector<1x32xf32>
    %383 = vector.extract_strided_slice %381 {offsets = [8, 0], sizes = [1, 32], strides = [1, 1]} : vector<16x32xf32> to vector<1x32xf32>
    %384 = tpu.concatenate %382, %383 in 0 : vector<1x32xf32>, vector<1x32xf32> -> vector<2x32xf32>
    %c0_160 = arith.constant 0 : index
    %c0_161 = arith.constant 0 : index
    %385 = vector.load %arg17[%c0_160, %c0_161] : memref<32x32xf32, #tpu.memory_space<vmem>>, vector<32x32xf32>
    %cst_162 = arith.constant dense<0.000000e+00> : vector<2x32xf32>
    %386 = tpu.matmul %384, %385, %cst_162 {dimension_numbers = #tpu.dot_dimension_numbers<[1], [0], [0], [1], [0, 0, 1, 1], [], []>} : vector<2x32xf32>, vector<32x32xf32>, vector<2x32xf32> -> vector<2x32xf32>
    %c0_163 = arith.constant 0 : index
    %c0_164 = arith.constant 0 : index
    %387 = vector.load %arg18[%c0_163, %c0_164] : memref<1x32xf32, #tpu.memory_space<vmem>>, vector<1x32xf32>
    %388 = vector.broadcast %387 : vector<1x32xf32> to vector<2x32xf32>
    %389 = arith.addf %386, %388 : vector<2x32xf32>
    %390 = math.tanh %389 : vector<2x32xf32>
    %c0_165 = arith.constant 0 : index
    %c0_166 = arith.constant 0 : index
    %391 = vector.load %arg19[%c0_165, %c0_166] : memref<32x128xf32, #tpu.memory_space<vmem>>, vector<32x128xf32>
    %cst_167 = arith.constant dense<0.000000e+00> : vector<2x128xf32>
    %392 = tpu.matmul %390, %391, %cst_167 {dimension_numbers = #tpu.dot_dimension_numbers<[1], [0], [0], [1], [0, 0, 1, 1], [], []>} : vector<2x32xf32>, vector<32x128xf32>, vector<2x128xf32> -> vector<2x128xf32>
    %c0_168 = arith.constant 0 : index
    %c0_169 = arith.constant 0 : index
    %393 = vector.load %arg20[%c0_168, %c0_169] : memref<1x128xf32, #tpu.memory_space<vmem>>, vector<1x128xf32>
    %394 = vector.broadcast %393 : vector<1x128xf32> to vector<2x128xf32>
    %395 = arith.addf %392, %394 : vector<2x128xf32>
    %c0_170 = arith.constant 0 : index
    %c0_171 = arith.constant 0 : index
    %396 = vector.load %arg21[%c0_170, %c0_171] : memref<2x128xf32, #tpu.memory_space<vmem>>, vector<2x128xf32>
    tpu.vector_store %arg21[%c0_170, %c0_171], %395 {strides = array<i32>} : memref<2x128xf32, #tpu.memory_space<vmem>>, vector<2x128xf32>,
    return
  }
  func.func @transform_0(%arg0: i32) -> (i32, i32) {
    %c0_i32 = arith.constant 0 : i32
    %c0_i32_0 = arith.constant 0 : i32
    %c0_i32_1 = arith.constant 0 : i32
    return %c0_i32, %c0_i32_0 : i32, i32
  }
  func.func @transform_1(%arg0: i32) -> (i32, i32) {
    %c0_i32 = arith.constant 0 : i32
    %c0_i32_0 = arith.constant 0 : i32
    %c0_i32_1 = arith.constant 0 : i32
    return %c0_i32, %c0_i32_0 : i32, i32
  }
  func.func @transform_2(%arg0: i32) -> (i32, i32) {
    %c0_i32 = arith.constant 0 : i32
    %c0_i32_0 = arith.constant 0 : i32
    %c0_i32_1 = arith.constant 0 : i32
    return %c0_i32, %c0_i32_0 : i32, i32
  }
  func.func @transform_3(%arg0: i32) -> (i32, i32) {
    %c0_i32 = arith.constant 0 : i32
    %c0_i32_0 = arith.constant 0 : i32
    %c0_i32_1 = arith.constant 0 : i32
    return %c0_i32, %c0_i32_0 : i32, i32
  }
  func.func @transform_4(%arg0: i32) -> (i32, i32, i32) {
    %c0_i32 = arith.constant 0 : i32
    %c0_i32_0 = arith.constant 0 : i32
    %c0_i32_1 = arith.constant 0 : i32
    %c0_i32_2 = arith.constant 0 : i32
    return %c0_i32, %c0_i32_0, %c0_i32_1 : i32, i32, i32
  }
  func.func @transform_5(%arg0: i32) -> (i32, i32, i32) {
    %c0_i32 = arith.constant 0 : i32
    %c0_i32_0 = arith.constant 0 : i32
    %c0_i32_1 = arith.constant 0 : i32
    %c0_i32_2 = arith.constant 0 : i32
    return %c0_i32, %c0_i32_0, %c0_i32_1 : i32, i32, i32
  }
  func.func @transform_6(%arg0: i32) -> (i32, i32, i32) {
    %c0_i32 = arith.constant 0 : i32
    %c0_i32_0 = arith.constant 0 : i32
    %c0_i32_1 = arith.constant 0 : i32
    %c0_i32_2 = arith.constant 0 : i32
    return %c0_i32, %c0_i32_0, %c0_i32_1 : i32, i32, i32
  }
  func.func @transform_7(%arg0: i32) -> (i32, i32, i32) {
    %c0_i32 = arith.constant 0 : i32
    %c0_i32_0 = arith.constant 0 : i32
    %c0_i32_1 = arith.constant 0 : i32
    %c0_i32_2 = arith.constant 0 : i32
    return %c0_i32, %c0_i32_0, %c0_i32_1 : i32, i32, i32
  }
  func.func @transform_8(%arg0: i32) -> (i32, i32, i32) {
    %c0_i32 = arith.constant 0 : i32
    %c0_i32_0 = arith.constant 0 : i32
    %c0_i32_1 = arith.constant 0 : i32
    %c0_i32_2 = arith.constant 0 : i32
    return %c0_i32, %c0_i32_0, %c0_i32_1 : i32, i32, i32
  }
  func.func @transform_9(%arg0: i32) -> (i32, i32, i32) {
    %c0_i32 = arith.constant 0 : i32
    %c0_i32_0 = arith.constant 0 : i32
    %c0_i32_1 = arith.constant 0 : i32
    %c0_i32_2 = arith.constant 0 : i32
    return %c0_i32, %c0_i32_0, %c0_i32_1 : i32, i32, i32
  }
  func.func @transform_10(%arg0: i32) -> (i32, i32, i32) {
    %c0_i32 = arith.constant 0 : i32
    %c0_i32_0 = arith.constant 0 : i32
    %c0_i32_1 = arith.constant 0 : i32
    %c0_i32_2 = arith.constant 0 : i32
    return %c0_i32, %c0_i32_0, %c0_i32_1 : i32, i32, i32
  }
  func.func @transform_11(%arg0: i32) -> (i32, i32, i32) {
    %c0_i32 = arith.constant 0 : i32
    %c0_i32_0 = arith.constant 0 : i32
    %c0_i32_1 = arith.constant 0 : i32
    %c0_i32_2 = arith.constant 0 : i32
    return %c0_i32, %c0_i32_0, %c0_i32_1 : i32, i32, i32
  }
  func.func @transform_12(%arg0: i32) -> (i32, i32, i32) {
    %c0_i32 = arith.constant 0 : i32
    %c0_i32_0 = arith.constant 0 : i32
    %c0_i32_1 = arith.constant 0 : i32
    %c0_i32_2 = arith.constant 0 : i32
    return %c0_i32, %c0_i32_0, %c0_i32_1 : i32, i32, i32
  }
  func.func @transform_13(%arg0: i32) -> (i32, i32, i32) {
    %c0_i32 = arith.constant 0 : i32
    %c0_i32_0 = arith.constant 0 : i32
    %c0_i32_1 = arith.constant 0 : i32
    %c0_i32_2 = arith.constant 0 : i32
    return %c0_i32, %c0_i32_0, %c0_i32_1 : i32, i32, i32
  }
  func.func @transform_14(%arg0: i32) -> (i32, i32, i32) {
    %c0_i32 = arith.constant 0 : i32
    %c0_i32_0 = arith.constant 0 : i32
    %c0_i32_1 = arith.constant 0 : i32
    %c0_i32_2 = arith.constant 0 : i32
    return %c0_i32, %c0_i32_0, %c0_i32_1 : i32, i32, i32
  }
  func.func @transform_15(%arg0: i32) -> (i32, i32, i32) {
    %c0_i32 = arith.constant 0 : i32
    %c0_i32_0 = arith.constant 0 : i32
    %c0_i32_1 = arith.constant 0 : i32
    %c0_i32_2 = arith.constant 0 : i32
    return %c0_i32, %c0_i32_0, %c0_i32_1 : i32, i32, i32
  }
  func.func @transform_16(%arg0: i32) -> (i32, i32) {
    %c0_i32 = arith.constant 0 : i32
    %c0_i32_0 = arith.constant 0 : i32
    %c0_i32_1 = arith.constant 0 : i32
    return %c0_i32, %c0_i32_0 : i32, i32
  }
  func.func @transform_17(%arg0: i32) -> (i32, i32) {
    %c0_i32 = arith.constant 0 : i32
    %c0_i32_0 = arith.constant 0 : i32
    %c0_i32_1 = arith.constant 0 : i32
    return %c0_i32, %c0_i32_0 : i32, i32
  }
  func.func @transform_18(%arg0: i32) -> (i32, i32) {
    %c0_i32 = arith.constant 0 : i32
    %c0_i32_0 = arith.constant 0 : i32
    %c0_i32_1 = arith.constant 0 : i32
    return %c0_i32, %c0_i32_0 : i32, i32
  }
  func.func @transform_19(%arg0: i32) -> (i32, i32) {
    %c0_i32 = arith.constant 0 : i32
    %c0_i32_0 = arith.constant 0 : i32
    %c0_i32_1 = arith.constant 0 : i32
    return %c0_i32, %c0_i32_0 : i32, i32
  }
  func.func @transform_20(%arg0: i32) -> (i32, i32) {
    %c0_i32 = arith.constant 0 : i32
    %c0_i32_0 = arith.constant 0 : i32
    %c0_i32_1 = arith.constant 0 : i32
    return %c0_i32, %c0_i32_0 : i32, i32
  }
}

</mosaic_0001>

<bundles_post_ra>
// kernel: bert_classifier_forward.1
= control target key start
LH: loop header
LB: loop body
LE: loop exit
PB: predicated region body
PF: predicated region fallthrough
CT: control target
= control target key end

     0   :  { %s3696_s0 = inlined_call_operand.vmem [shape: f32[16,32], index: 0, kind: input, shape index: {}]   ;;  %s3697_s1 = inlined_call_operand.vmem [shape: f32[2,8], index: 1, kind: input, shape index: {}]   ;;  %s3698_s2 = inlined_call_operand.vmem [shape: f32[1,32], index: 2, kind: input, shape index: {}]   ;;  %s3699_s3 = inlined_call_operand.vmem [shape: f32[1,32], index: 3, kind: input, shape index: {}]   ;;  %s3700_s4 = inlined_call_operand.vmem [shape: f32[2,32,96], index: 4, kind: input, shape index: {}]   ;;  %s3701_s5 = inlined_call_operand.vmem [shape: f32[2,1,96], index: 5, kind: input, shape index: {}]   ;;  %s3702_s6 = inlined_call_operand.vmem [shape: f32[2,32,32], index: 6, kind: input, shape index: {}]   ;;  %s3703_s7 = inlined_call_operand.vmem [shape: f32[2,1,32], index: 7, kind: input, shape index: {}]   ;;  %s3704_s8 = inlined_call_operand.vmem [shape: f32[2,1,32], index: 8, kind: input, shape index: {}]   ;;  %s3705_s9 = inlined_call_operand.vmem [shape: f32[2,1,32], index: 9, kind: input, shape index: {}]   ;;  %s3706_s10 = inlined_call_operand.vmem [shape: f32[2,32,64], index: 10, kind: input, shape index: {}]   ;;  %s3707_s11 = inlined_call_operand.vmem [shape: f32[2,1,64], index: 11, kind: input, shape index: {}]   ;;  %s3708_s12 = inlined_call_operand.vmem [shape: f32[2,64,32], index: 12, kind: input, shape index: {}]   ;;  %s3709_s13 = inlined_call_operand.vmem [shape: f32[2,1,32], index: 13, kind: input, shape index: {}]   ;;  %s3710_s14 = inlined_call_operand.vmem [shape: f32[2,1,32], index: 14, kind: input, shape index: {}]   ;;  %s3711_s15 = inlined_call_operand.vmem [shape: f32[2,1,32], index: 15, kind: input, shape index: {}]   ;;  %s3712_s16 = inlined_call_operand.vmem [shape: f32[32,32], index: 16, kind: input, shape index: {}]   ;;  %s3713_s17 = inlined_call_operand.vmem [shape: f32[1,32], index: 17, kind: input, shape index: {}]   ;;  %s3714_s18 = inlined_call_operand.vmem [shape: f32[32,128], index: 18, kind: input, shape index: {}]   ;;  %s3715_s19 = inlined_call_operand.vmem [shape: f32[1,128], index: 19, kind: input, shape index: {}]   ;;  %s3716_s20 = inlined_call_operand.hbm [shape: f32[2,128], index: 20, kind: output, shape index: {}]  }
   0x1   :  { %3719 = sst [smem:[#allocation5_spill]] %s3696_s0 }
   0x2   :  { %3720 = sst [smem:[#allocation6_spill]] %s3697_s1 }
   0x3   :  { %3721 = sst [smem:[#allocation7_spill]] %s3698_s2 }
   0x4   :  { %3722 = sst [smem:[#allocation8_spill]] %s3699_s3 }
   0x5   :  { %3723 = sst [smem:[#allocation9_spill]] %s3700_s4 }
   0x6   :  { %s3724_s23 = sld [smem:[#allocation5_spill]]  ;;  %vm70_vm0 = vcmask 261120  }
   0xc   :  { %v66_v0 = vld [vmem:[%s3724_s23] sm:$0xff]  ;;  %v67_v1 = vld [vmem:[%s3724_s23 + $0x8] sm:$0xff] }
   0xd   :  { %25 = vsyncpa [#allocation3], 0  ;;  %v71_v2 = vsel %vm70_vm0, %v66_v0, 0.0  ;;  %v74_v3 = vsel %vm70_vm0, %v67_v1, 0.0  ;;  %s3725_s26 = sld [smem:[#allocation9_spill]]  ;;  %v3132_v34 = vmov 0.0   ;;  %v288_v46 = vlaneseq }
   0xe   :  { %72 = vadd.xlane.f32.xlu0 %v71_v2  ;;  %s3726_s22 = sld [smem:[#allocation7_spill]]  ;;  %2844 = vmatprep.subr.mxu1 %v3132_v34  ;;  %vm3133_vm1 = vmmov 0   ;;  %v2647_v36 = vld [vmem:[%s3701_s5] ss:$0 sm:$0xff]  ;;  %s3134_s27 = smov 80   ;;  %vm212_vm2 = vcmask 130048  }
   0xf   :  { %s3727_s2 = sld [smem:[#allocation8_spill]]  ;;  %2846 = vmatprep.mubr.msk.f32.mxu1 %vm3133_vm1, %v3132_v34  ;;  %s3135_s28 = smov 96   ;;  %v289_v49 = vshrl.u32 %v288_v46, 7  ;;  %vm293_vm3 = vcmask 64512   ;;  %vm1158_vm4 = vcmask 523264   ;;  %vm2459_vm5 = vcmask 1040384  }
  0x10   :  { %s3136_s4 = smov 112   ;;  %s3728_s0 = sld [smem:[#allocation6_spill]] }
  0x11   :  { %v290_v51 = vsub.s32 0, %v289_v49  ;;  %v633_v60 = vsub.s32 1, %v289_v49  ;;  %s3137_s21 = smov 48   ;;  %s3138_s1 = smov 64  }
  0x12   :  { %75 = vadd.xlane.f32.xlu0 %v74_v3 }
  0x13   :  { %v120_v14 = vld [vmem:[%s3725_s26 + $0x18] sm:$0xff]  ;;  %v119_v15 = vld [vmem:[%s3725_s26 + $0x10] sm:$0xff]  ;;  %v118_v16 = vld [vmem:[%s3725_s26 + $0x8] sm:$0xff] }
  0x14   :  { %2833 = vmatprep.subr.mxu0 %v120_v14  ;;  %v117_v17 = vld [vmem:[%s3725_s26] sm:$0xff] }
  0x15   :  { %2834 = vmatpush3.msra.mxu0 %v120_v14  ;;  %v2645_v25 = vld [vmem:[%s3726_s22] ss:$0 sm:$0xff] }
  0x16   :  { %2835 = vmatprep.subr.mxu0 %v119_v15  ;;  %v2646_v27 = vld [vmem:[%s3727_s2] ss:$0 sm:$0xff] }
  0x17   :  { %2836 = vmatpush3.msra.mxu0 %v119_v15  ;;  %v114_v47 = vld [vmem:[%s3728_s0] sm:$0x3]  ;;  %s3139_s0 = smov 16  }
  0x18   :  { %2837 = vmatprep.subr.mxu0 %v118_v16  ;;  %v115_v48 = vsub.f32 1.0, %v114_v47 }
  0x19   :  { %2838 = vmatpush3.msra.mxu0 %v118_v16 }
  0x1a   :  { %2839 = vmatprep.subr.mxu0 %v117_v17  ;;  %v116_v50 = vmul.f32 -1e+09, %v115_v48 }
  0x1b   :  { %2840 = vmatpush3.msra.mxu0 %v117_v17 }
  0x1c   :  { %2854 = vmatprep.subr.mxu0 %v3132_v34  ;;  %v3329_v52 = vrot.slane %v116_v50, %v290_v51  ;;  %v897_v51 = vld [vmem:[%s3702_s6 + $0x10] sm:$0xff] }
  0x97   :  { %v73_v4 = vpop.xlane.xlu0 %72 }
  0x98   :  { %v78_v5 = vmul.f32 0.03125, %v73_v4 }
  0x9a   :  { %v80_v6 = vsub.f32 %v66_v0, %v78_v5  ;;  %v3335_v0 = vrot.slane %v116_v50, %v633_v60  ;;  %v898_v50 = vld [vmem:[%s3702_s6 + $0x18] sm:$0xff] }
  0x9b   :  { %v76_v7 = vpop.xlane.xlu0 %75 }
  0x9c   :  { %v79_v8 = vmul.f32 0.03125, %v76_v7  ;;  %v82_v9 = vmul.f32 %v80_v6, %v80_v6 }
  0x9e   :  { %v81_v10 = vsub.f32 %v67_v1, %v79_v8  ;;  %v84_v11 = vsel %vm70_vm0, %v82_v9, 0.0 }
  0x9f   :  { %85 = vadd.xlane.f32.xlu1 %v84_v11 }
  0xa0   :  { %v83_v12 = vmul.f32 %v81_v10, %v81_v10 }
  0xa2   :  { %v87_v13 = vsel %vm70_vm0, %v83_v12, 0.0 }
  0xa3   :  { %88 = vadd.xlane.f32.xlu1 %v87_v13 }
 0x128   :  { %v86_v18 = vpop.xlane.xlu1 %85 }
 0x129   :  { %v90_v19 = vmul.f32 0.03125, %v86_v18 }
 0x12b   :  { %v92_v20 = vadd.f32 1e-12, %v90_v19 }
 0x12c   :  { %v89_v21 = vpop.xlane.xlu1 %88 }
 0x12d   :  { %3048 = vrsqrt.f32 %v92_v20  ;;  %v91_v22 = vmul.f32 0.03125, %v89_v21 }
 0x12f   :  { %v93_v23 = vadd.f32 1e-12, %v91_v22 }
 0x131   :  { %3050 = vrsqrt.f32 %v93_v23 }
 0x13a   :  { %v3049_v24 = vpop.eup %3048 }
 0x13b   :  { %v96_v26 = vmul.f32 %v3049_v24, %v80_v6 }
 0x13d   :  { %v104_v28 = vmul.f32 %v2645_v25, %v96_v26 }
 0x13e   :  { %v3051_v29 = vpop.eup %3050 }
 0x13f   :  { %v97_v30 = vmul.f32 %v3051_v29, %v81_v10  ;;  %v3274_v31 = vadd.f32 %v2646_v27, %v104_v28 }
 0x141   :  { %v105_v32 = vmul.f32 %v2645_v25, %v97_v30  ;;  %2841 = vmatprep.mubr.msk.f32.mxu0 %vm70_vm0, %v3274_v31 }
 0x143   :  { %v3278_v33 = vadd.f32 %v2646_v27, %v105_v32 }
 0x145   :  { %2842 = vmatmul.mubr.msk.f32.vlgmr.msra.gmra.mxu0 %vm70_vm0, %v3278_v33 }
 0x146   :  { %2856 = vmatprep.mubr.msk.f32.mxu0 %vm3133_vm1, %v3132_v34 }
 0x205   :  { %v2843_v35 = vpop.f32.mrf.mxu0 }
 0x206   :  { %v3297_v39 = vadd.f32 %v2843_v35, %v2647_v36 }
 0x207   :  { %v200_v37 = vpop.f32.mrf.mxu0 }
 0x208   :  { %v3291_v38 = vadd.f32 %v2647_v36, %v200_v37 }
 0x20a   :  { %383 = vrot.lane.b32.xlu1 %v3291_v38, %s3134_s27  ;;  %210 = vrot.lane.b32.xlu0 %v3291_v38, %s3135_s28 }
 0x20e   :  { %381 = vrot.lane.b32.xlu1 %v3291_v38, %s3136_s4  ;;  %725 = vrot.lane.b32.xlu0 %v3297_v39, %s3134_s27 }
 0x212   :  { %554 = vrot.lane.b32.xlu1 %v3297_v39, %s3135_s28 }
 0x216   :  { %723 = vrot.lane.b32.xlu1 %v3297_v39, %s3136_s4 }
 0x27c   :  { %v384_v40 = vpop.permute.xlu1 %383  ;;  %v211_v41 = vpop.permute.xlu0 %210 }
 0x27d   :  { %2845 = vmatpush3.xpose.msk.msra.mxu1 %vm212_vm2, %v211_v41  ;;  %2855 = vmatpush3.xpose.msk.msra.mxu0 %vm212_vm2, %v384_v40 }
 0x27e   :  { %2864 = vmatprep.subr.mxu0 %v3132_v34  ;;  %2849 = vmatprep.subr.mxu1 %v3132_v34 }
 0x280   :  { %v382_v42 = vpop.permute.xlu1 %381  ;;  %2847 = vmatmul.mubr.msk.f32.vlgmr.msra.gmra.mxu1 %vm212_vm2, %v3291_v38  ;;  %v726_v44 = vpop.permute.xlu0 %725 }
 0x281   :  { %2857 = vmatmul.mubr.msk.f32.vlgmr.msra.gmra.mxu0 %vm212_vm2, %v382_v42  ;;  %2851 = vmatprep.mubr.msk.f32.mxu1 %vm3133_vm1, %v3132_v34 }
 0x282   :  { %2866 = vmatprep.mubr.msk.f32.mxu0 %vm3133_vm1, %v3132_v34 }
 0x284   :  { %v555_v43 = vpop.permute.xlu1 %554 }
 0x285   :  { %2865 = vmatpush3.xpose.msk.msra.mxu0 %vm212_vm2, %v555_v43 }
 0x286   :  { %2874 = vmatprep.subr.mxu0 %v3132_v34 }
 0x288   :  { %2867 = vmatmul.mubr.msk.f32.vlgmr.msra.gmra.mxu0 %vm212_vm2, %v3297_v39  ;;  %v724_v45 = vpop.permute.xlu1 %723 }
 0x289   :  { %2875 = vmatpush3.xpose.msk.msra.mxu0 %vm212_vm2, %v726_v44  ;;  %2876 = vmatprep.mubr.msk.f32.mxu0 %vm3133_vm1, %v3132_v34 }
 0x28a   :  { %2884 = vmatprep.subr.mxu0 %v898_v50 }
 0x28c   :  { %2877 = vmatmul.mubr.msk.f32.vlgmr.msra.gmra.mxu0 %vm212_vm2, %v724_v45 }
 0x28d   :  { %2885 = vmatpush3.msra.mxu0 %v898_v50  ;;  %v1144_v50 = vld [vmem:[%s3708_s12 + $0x8] sm:$0xff] }
 0x28e   :  { %2886 = vmatprep.subr.mxu0 %v897_v51 }
 0x28f   :  { %2887 = vmatpush3.msra.mxu0 %v897_v51  ;;  %v1143_v51 = vld [vmem:[%s3708_s12] sm:$0xff] }
 0x340   :  { %v283_v53 = vpop.f32.mrf.mxu1 }
 0x341   :  { %v287_v54 = vmul.f32 0.25, %v283_v53  ;;  %v455_v55 = vpop.f32.mrf.mxu0  ;;  %v896_v53 = vld [vmem:[%s3702_s6 + $0x8] sm:$0xff] }
 0x342   :  { %v459_v56 = vmul.f32 0.25, %v455_v55  ;;  %v2848_v57 = vpop.f32.mrf.mxu1  ;;  %2888 = vmatprep.subr.mxu0 %v896_v53 }
 0x343   :  { %v2858_v58 = vpop.f32.mrf.mxu0  ;;  %v292_v59 = vadd.f32 %v3329_v52, %v287_v54  ;;  %v895_v54 = vld [vmem:[%s3702_s6] sm:$0xff]  ;;  %2889 = vmatpush3.msra.mxu0 %v896_v53 }
 0x344   :  { %v460_v61 = vadd.f32 %v459_v56, %v3329_v52  ;;  %2890 = vmatprep.subr.mxu0 %v895_v54  ;;  %v2667_v53 = vld [vmem:[%s3707_s11] ss:$0 sm:$0xff] }
 0x345   :  { %v294_v62 = vsel %vm293_vm3, %v292_v59, -inf  ;;  %2891 = vmatpush3.msra.mxu0 %v895_v54 }
 0x346   :  { %295 = vmax.xlane.f32.xlu0 %v294_v62  ;;  %v461_v63 = vsel %vm293_vm3, %v460_v61, -inf }
 0x347   :  { %462 = vmax.xlane.f32.xlu1 %v461_v63 }
 0x348   :  { %v626_v1 = vpop.f32.mrf.mxu0 }
 0x349   :  { %v630_v2 = vmul.f32 0.25, %v626_v1 }
 0x34a   :  { %v2868_v3 = vpop.f32.mrf.mxu0 }
 0x34b   :  { %v635_v4 = vadd.f32 %v3335_v0, %v630_v2 }
 0x34c   :  { %v797_v5 = vpop.f32.mrf.mxu0 }
 0x34d   :  { %v801_v6 = vmul.f32 0.25, %v797_v5  ;;  %v636_v7 = vsel %vm293_vm3, %v635_v4, -inf }
 0x34e   :  { %637 = vmax.xlane.f32.xlu0 %v636_v7  ;;  %v2878_v8 = vpop.f32.mrf.mxu0 }
 0x34f   :  { %v802_v9 = vadd.f32 %v801_v6, %v3335_v0 }
 0x351   :  { %v803_v10 = vsel %vm293_vm3, %v802_v9, -inf }
 0x352   :  { %804 = vmax.xlane.f32.xlu0 %v803_v10 }
 0x3cf   :  { %v296_v11 = vpop.xlane.xlu0 %295 }
 0x3d0   :  { %v297_v12 = vsub.f32 %v292_v59, %v296_v11  ;;  %v463_v13 = vpop.xlane.xlu1 %462 }
 0x3d1   :  { %v464_v14 = vsub.f32 %v460_v61, %v463_v13 }
 0x3d2   :  { %v298_v15 = vmul.f32 1.442695, %v297_v12 }
 0x3d3   :  { %v465_v16 = vmul.f32 1.442695, %v464_v14 }
 0x3d4   :  { %3052 = vpow2.f32 %v298_v15 }
 0x3d5   :  { %3054 = vpow2.f32 %v465_v16 }
 0x3d7   :  { %v638_v17 = vpop.xlane.xlu0 %637 }
 0x3d8   :  { %v639_v18 = vsub.f32 %v635_v4, %v638_v17  ;;  %v2662_v4 = vld [vmem:[%s3703_s7] ss:$0 sm:$0xff] }
 0x3da   :  { %v640_v19 = vmul.f32 1.442695, %v639_v18 }
 0x3db   :  { %v805_v26 = vpop.xlane.xlu0 %804 }
 0x3dc   :  { %3056 = vpow2.f32 %v640_v19  ;;  %v806_v27 = vsub.f32 %v802_v9, %v805_v26 }
 0x3de   :  { %v807_v28 = vmul.f32 1.442695, %v806_v27 }
 0x3e0   :  { %3058 = vpow2.f32 %v807_v28 }
 0x3e1   :  { %v3053_v20 = vpop.eup %3052 }
 0x3e2   :  { %v3055_v21 = vpop.eup %3054  ;;  %v300_v22 = vsel %vm293_vm3, %v3053_v20, 0.0 }
 0x3e3   :  { %301 = vadd.xlane.f32.xlu0 %v300_v22  ;;  %v467_v23 = vsel %vm293_vm3, %v3055_v21, 0.0  ;;  %v1035_v22 = vld [vmem:[%s3706_s10 + $0x10] sm:$0xff] }
 0x3e4   :  { %468 = vadd.xlane.f32.xlu1 %v467_v23  ;;  %v1034_v23 = vld [vmem:[%s3706_s10 + $0x8] sm:$0xff] }
 0x3e9   :  { %v3057_v24 = vpop.eup %3056 }
 0x3ea   :  { %v642_v25 = vsel %vm293_vm3, %v3057_v24, 0.0 }
 0x3eb   :  { %643 = vadd.xlane.f32.xlu0 %v642_v25 }
 0x3ed   :  { %v3059_v29 = vpop.eup %3058 }
 0x3ee   :  { %v809_v30 = vsel %vm293_vm3, %v3059_v29, 0.0 }
 0x3f5   :  { %472 = vrot.lane.b32.xlu1 %v3291_v38, %s3137_s21 }
 0x3f9   :  { %647 = vrot.lane.b32.xlu1 %v3297_v39, %s3138_s1 }
 0x401   :  { %305 = vrot.lane.b32.xlu0 %v3291_v38, %s3138_s1 }
 0x41d   :  { %810 = vadd.xlane.f32.xlu1 %v809_v30 }
 0x42e   :  { %814 = vrot.lane.b32.xlu1 %v3297_v39, %s3137_s21 }
 0x46c   :  { %v302_v32 = vpop.xlane.xlu0 %301 }
 0x46d   :  { %3060 = vrcp.f32 %v302_v32  ;;  %v469_v35 = vpop.xlane.xlu1 %468 }
 0x46e   :  { %3062 = vrcp.f32 %v469_v35  ;;  %v2665_v35 = vld [vmem:[%s3704_s8] ss:$0 sm:$0xff] }
 0x471   :  { %v473_v38 = vpop.permute.xlu1 %472 }
 0x474   :  { %v644_v36 = vpop.xlane.xlu0 %643 }
 0x475   :  { %3064 = vrcp.f32 %v644_v36  ;;  %v648_v43 = vpop.permute.xlu1 %647 }
 0x478   :  { %v306_v37 = vpop.permute.xlu0 %305 }
 0x479   :  { %2850 = vmatpush3.msra.mxu1 %v306_v37  ;;  %v2666_v37 = vld [vmem:[%s3705_s9] ss:$0 sm:$0xff] }
 0x47a   :  { %v3061_v40 = vpop.eup %3060  ;;  %2859 = vmatprep.subr.mxu1 %v3132_v34 }
 0x47b   :  { %v304_v41 = vmul.f32 %v3061_v40, %v3053_v20  ;;  %v3063_v42 = vpop.eup %3062 }
 0x47c   :  { %v471_v39 = vmul.f32 %v3063_v42, %v3055_v21 }
 0x47d   :  { %2852 = vmatmul.mubr.msk.f32.vlgmr.msra.gmra.mxu1 %vm293_vm3, %v304_v41 }
 0x47e   :  { %2860 = vmatpush3.msra.mxu1 %v473_v38  ;;  %2861 = vmatprep.mubr.msk.f32.mxu1 %vm3133_vm1, %v3132_v34 }
 0x47f   :  { %2869 = vmatprep.subr.mxu1 %v3132_v34 }
 0x481   :  { %2862 = vmatmul.mubr.msk.f32.vlgmr.msra.gmra.mxu1 %vm293_vm3, %v471_v39 }
 0x482   :  { %v3065_v44 = vpop.eup %3064  ;;  %2870 = vmatpush3.msra.mxu1 %v648_v43  ;;  %2871 = vmatprep.mubr.msk.f32.mxu1 %vm3133_vm1, %v3132_v34 }
 0x483   :  { %v646_v45 = vmul.f32 %v3065_v44, %v3057_v24  ;;  %2879 = vmatprep.subr.mxu1 %v3132_v34  ;;  %v1033_v24 = vld [vmem:[%s3706_s10] sm:$0xff]  ;;  %v1150_v44 = vld [vmem:[%s3708_s12 + $0x38] sm:$0xff] }
 0x484   :  { %2906 = vmatprep.subr.mxu0 %v1150_v44 }
 0x485   :  { %2872 = vmatmul.mubr.msk.f32.vlgmr.msra.gmra.mxu1 %vm293_vm3, %v646_v45  ;;  %v1149_v45 = vld [vmem:[%s3708_s12 + $0x30] sm:$0xff] }
 0x486   :  { %2881 = vmatprep.mubr.msk.f32.mxu1 %vm3133_vm1, %v3132_v34 }
 0x4a6   :  { %v811_v46 = vpop.xlane.xlu1 %810 }
 0x4a7   :  { %3066 = vrcp.f32 %v811_v46  ;;  %v1148_v46 = vld [vmem:[%s3708_s12 + $0x28] sm:$0xff] }
 0x4aa   :  { %v815_v47 = vpop.permute.xlu1 %814 }
 0x4ab   :  { %2880 = vmatpush3.msra.mxu1 %v815_v47  ;;  %v1147_v47 = vld [vmem:[%s3708_s12 + $0x20] sm:$0xff] }
 0x4b4   :  { %v3067_v48 = vpop.eup %3066 }
 0x4b5   :  { %v813_v49 = vmul.f32 %v3067_v48, %v3059_v29  ;;  %v1146_v48 = vld [vmem:[%s3708_s12 + $0x18] sm:$0xff] }
 0x4b7   :  { %2882 = vmatmul.mubr.msk.f32.vlgmr.msra.gmra.mxu1 %vm293_vm3, %v813_v49  ;;  %v1145_v49 = vld [vmem:[%s3708_s12 + $0x10] sm:$0xff] }
 0x53d   :  { %v377_v55 = vpop.f32.mrf.mxu1 }
 0x53f   :  { %v2853_v56 = vpop.f32.mrf.mxu1 }
 0x541   :  { %v544_v57 = vpop.f32.mrf.mxu1 }
 0x542   :  { %549 = vrot.lane.b32.xlu0 %v544_v57, %s3139_s0 }
 0x543   :  { %v2863_v58 = vpop.f32.mrf.mxu1 }
 0x545   :  { %v719_v59 = vpop.f32.mrf.mxu1 }
 0x547   :  { %v2873_v60 = vpop.f32.mrf.mxu1 }
 0x577   :  { %v886_v61 = vpop.f32.mrf.mxu1 }
 0x578   :  { %891 = vrot.lane.b32.xlu1 %v886_v61, %s3139_s0 }
 0x579   :  { %v2883_v62 = vpop.f32.mrf.mxu1 }
 0x5b4   :  { %v550_v63 = vpop.permute.xlu0 %549 }
 0x5b5   :  { %v552_v1 = vsel %vm212_vm2, %v377_v55, %v550_v63 }
 0x5b6   :  { %2892 = vmatprep.mubr.msk.f32.mxu0 %vm70_vm0, %v552_v1 }
 0x5ea   :  { %v892_v2 = vpop.permute.xlu1 %891 }
 0x5eb   :  { %v894_v3 = vsel %vm212_vm2, %v719_v59, %v892_v2 }
 0x5ec   :  { %2893 = vmatmul.mubr.msk.f32.vlgmr.msra.gmra.mxu0 %vm70_vm0, %v894_v3 }
 0x5ed   :  { %2907 = vmatpush3.msra.mxu0 %v1150_v44  ;;  %v2673_v44 = vld [vmem:[%s3710_s14] ss:$0 sm:$0xff] }
 0x5ee   :  { %2908 = vmatprep.subr.mxu0 %v1149_v45 }
 0x5ef   :  { %2909 = vmatpush3.msra.mxu0 %v1149_v45 }
 0x5f0   :  { %2910 = vmatprep.subr.mxu0 %v1148_v46 }
 0x5f1   :  { %2911 = vmatpush3.msra.mxu0 %v1148_v46 }
 0x5f2   :  { %2912 = vmatprep.subr.mxu0 %v1147_v47 }
 0x5f3   :  { %2913 = vmatpush3.msra.mxu0 %v1147_v47 }
 0x5f4   :  { %2914 = vmatprep.subr.mxu0 %v1146_v48 }
 0x5f5   :  { %2915 = vmatpush3.msra.mxu0 %v1146_v48 }
 0x5f6   :  { %2916 = vmatprep.subr.mxu0 %v1145_v49 }
 0x5f7   :  { %2917 = vmatpush3.msra.mxu0 %v1145_v49  ;;  %v2674_v49 = vld [vmem:[%s3711_s15] ss:$0 sm:$0xff] }
 0x5f8   :  { %2918 = vmatprep.subr.mxu0 %v1144_v50 }
 0x5f9   :  { %2919 = vmatpush3.msra.mxu0 %v1144_v50 }
 0x5fa   :  { %2920 = vmatprep.subr.mxu0 %v1143_v51 }
 0x5fb   :  { %2921 = vmatpush3.msra.mxu0 %v1143_v51 }
 0x5fc   :  { %2946 = vmatprep.subr.mxu0 %v3132_v34 }
 0x6ac   :  { %v2894_v5 = vpop.f32.mrf.mxu0 }
 0x6ad   :  { %v984_v6 = vadd.f32 %v2894_v5, %v2662_v4 }
 0x6ae   :  { %v978_v7 = vpop.f32.mrf.mxu0 }
 0x6af   :  { %v979_v8 = vadd.f32 %v2662_v4, %v978_v7  ;;  %v988_v9 = vadd.f32 %v984_v6, %v3278_v33 }
 0x6b1   :  { %v994_v10 = vsel %vm70_vm0, %v988_v9, 0.0  ;;  %v987_v11 = vadd.f32 %v979_v8, %v3274_v31  ;;  %v1036_v31 = vld [vmem:[%s3706_s10 + $0x18] sm:$0xff] }
 0x6b2   :  { %995 = vadd.xlane.f32.xlu1 %v994_v10  ;;  %2895 = vmatprep.subr.mxu1 %v1036_v31 }
 0x6b3   :  { %v991_v12 = vsel %vm70_vm0, %v987_v11, 0.0  ;;  %2896 = vmatpush3.msra.mxu1 %v1036_v31 }
 0x6b4   :  { %992 = vadd.xlane.f32.xlu0 %v991_v12  ;;  %2897 = vmatprep.subr.mxu1 %v1035_v22 }
 0x6b5   :  { %2898 = vmatpush3.msra.mxu1 %v1035_v22 }
 0x6b6   :  { %2899 = vmatprep.subr.mxu1 %v1034_v23 }
 0x6b7   :  { %2900 = vmatpush3.msra.mxu1 %v1034_v23 }
 0x6b8   :  { %2901 = vmatprep.subr.mxu1 %v1033_v24 }
 0x6b9   :  { %2902 = vmatpush3.msra.mxu1 %v1033_v24 }
 0x73b   :  { %v996_v13 = vpop.xlane.xlu1 %995 }
 0x73c   :  { %v998_v14 = vmul.f32 0.03125, %v996_v13  ;;  %v2670_v13 = vld [vmem:[%s3709_s13] ss:$0 sm:$0xff] }
 0x73d   :  { %v993_v15 = vpop.xlane.xlu0 %992 }
 0x73e   :  { %v997_v16 = vmul.f32 0.03125, %v993_v15  ;;  %v1000_v17 = vsub.f32 %v988_v9, %v998_v14 }
 0x740   :  { %v999_v18 = vsub.f32 %v987_v11, %v997_v16  ;;  %v1002_v21 = vmul.f32 %v1000_v17, %v1000_v17 }
 0x742   :  { %v1001_v19 = vmul.f32 %v999_v18, %v999_v18  ;;  %v1006_v33 = vsel %vm70_vm0, %v1002_v21, 0.0 }
 0x744   :  { %v1003_v20 = vsel %vm70_vm0, %v1001_v19, 0.0 }
 0x745   :  { %1004 = vadd.xlane.f32.xlu0 %v1003_v20 }
 0x749   :  { %1007 = vadd.xlane.f32.xlu0 %v1006_v33 }
 0x7ce   :  { %v1005_v25 = vpop.xlane.xlu0 %1004 }
 0x7cf   :  { %v1009_v26 = vmul.f32 0.03125, %v1005_v25 }
 0x7d1   :  { %v1011_v27 = vadd.f32 1e-12, %v1009_v26 }
 0x7d2   :  { %v1008_v28 = vpop.xlane.xlu0 %1007 }
 0x7d3   :  { %3068 = vrsqrt.f32 %v1011_v27  ;;  %v1010_v29 = vmul.f32 0.03125, %v1008_v28 }
 0x7d5   :  { %v1012_v30 = vadd.f32 1e-12, %v1010_v29 }
 0x7d7   :  { %3070 = vrsqrt.f32 %v1012_v30  ;;  %v2678_v30 = vld [vmem:[%s3725_s26 + $0x38] sm:$0xff] }
 0x7d8   :  { %2925 = vmatprep.subr.mxu1 %v2678_v30 }
 0x7e0   :  { %v3069_v32 = vpop.eup %3068 }
 0x7e1   :  { %v1015_v36 = vmul.f32 %v3069_v32, %v999_v18  ;;  %v2677_v32 = vld [vmem:[%s3725_s26 + $0x30] sm:$0xff] }
 0x7e3   :  { %v1023_v40 = vmul.f32 %v2665_v35, %v1015_v36  ;;  %v2675_v36 = vld [vmem:[%s3725_s26 + $0x20] sm:$0xff] }
 0x7e4   :  { %v3071_v38 = vpop.eup %3070 }
 0x7e5   :  { %v1016_v41 = vmul.f32 %v3071_v38, %v1000_v17  ;;  %v3411_v42 = vadd.f32 %v2666_v37, %v1023_v40 }
 0x7e7   :  { %v1024_v39 = vmul.f32 %v2665_v35, %v1016_v41  ;;  %2903 = vmatprep.mubr.msk.f32.mxu1 %vm70_vm0, %v3411_v42  ;;  %v2676_v35 = vld [vmem:[%s3725_s26 + $0x28] sm:$0xff] }
 0x7e9   :  { %v1032_v43 = vadd.f32 %v2666_v37, %v1024_v39 }
 0x7eb   :  { %2904 = vmatmul.mubr.msk.f32.vlgmr.msra.gmra.mxu1 %vm70_vm0, %v1032_v43 }
 0x7ec   :  { %2926 = vmatpush3.msra.mxu1 %v2678_v30 }
 0x7ed   :  { %2927 = vmatprep.subr.mxu1 %v2677_v32 }
 0x7ee   :  { %2928 = vmatpush3.msra.mxu1 %v2677_v32 }
 0x7ef   :  { %2929 = vmatprep.subr.mxu1 %v2676_v35 }
 0x7f0   :  { %2930 = vmatpush3.msra.mxu1 %v2676_v35 }
 0x7f1   :  { %2931 = vmatprep.subr.mxu1 %v2675_v36 }
 0x7f2   :  { %2932 = vmatpush3.msra.mxu1 %v2675_v36 }
 0x7f3   :  { %2936 = vmatprep.subr.mxu1 %v3132_v34 }
 0x8ab   :  { %v2905_v54 = vpop.f32.mrf.mxu1 }
 0x8ac   :  { %v1122_v55 = vadd.f32 %v2905_v54, %v2667_v53 }
 0x8ad   :  { %v1116_v56 = vpop.f32.mrf.mxu1 }
 0x8ae   :  { %v1128_v57 = vmul.f32 0.044715, %v1122_v55  ;;  %v1117_v58 = vadd.f32 %v2667_v53, %v1116_v56  ;;  %v1126_v10 = vmul.f32 0.5, %v1122_v55 }
 0x8b0   :  { %v1130_v59 = vmul.f32 %v1128_v57, %v1122_v55  ;;  %v1127_v60 = vmul.f32 0.044715, %v1117_v58  ;;  %v1125_v8 = vmul.f32 0.5, %v1117_v58 }
 0x8b2   :  { %v1132_v61 = vmul.f32 %v1130_v59, %v1122_v55  ;;  %v1129_v62 = vmul.f32 %v1127_v60, %v1117_v58 }
 0x8b4   :  { %v1134_v63 = vadd.f32 %v1132_v61, %v1122_v55  ;;  %v1131_v1 = vmul.f32 %v1129_v62, %v1117_v58  ;;  %v2680_v55 = vld [vmem:[%s3701_s5 + $0x1] ss:$0 sm:$0xff] }
 0x8b6   :  { %v1136_v2 = vmul.f32 0.7978846, %v1134_v63  ;;  %v1133_v3 = vadd.f32 %v1131_v1, %v1117_v58 }
 0x8b8   :  { %3072 = vtanh.f32 %v1136_v2  ;;  %v1135_v4 = vmul.f32 0.7978846, %v1133_v3 }
 0x8ba   :  { %3074 = vtanh.f32 %v1135_v4 }
 0x8c5   :  { %v3073_v5 = vpop.eup %3072 }
 0x8c6   :  { %v1140_v7 = vadd.f32 1.0, %v3073_v5 }
 0x8c7   :  { %v3075_v6 = vpop.eup %3074 }
 0x8c8   :  { %v1139_v9 = vadd.f32 1.0, %v3075_v6  ;;  %v1142_v12 = vmul.f32 %v1140_v7, %v1126_v10 }
 0x8ca   :  { %v1141_v11 = vmul.f32 %v1139_v9, %v1125_v8 }
 0x8cc   :  { %2922 = vmatprep.mubr.msk.f32.mxu0 %vm1158_vm4, %v1141_v11 }
 0x8cd   :  { %2923 = vmatmul.mubr.msk.f32.vlgmr.msra.gmra.mxu0 %vm1158_vm4, %v1142_v12 }
 0x8ce   :  { %2948 = vmatprep.mubr.msk.f32.mxu0 %vm3133_vm1, %v3132_v34 }
 0x98d   :  { %v2924_v14 = vpop.f32.mrf.mxu0 }
 0x98e   :  { %v1237_v15 = vadd.f32 %v2924_v14, %v2670_v13 }
 0x98f   :  { %v1231_v16 = vpop.f32.mrf.mxu0 }
 0x990   :  { %v1232_v17 = vadd.f32 %v2670_v13, %v1231_v16  ;;  %v1241_v18 = vadd.f32 %v1237_v15, %v1032_v43 }
 0x992   :  { %v1247_v19 = vsel %vm70_vm0, %v1241_v18, 0.0  ;;  %v1240_v20 = vadd.f32 %v1232_v17, %v3411_v42 }
 0x993   :  { %1248 = vadd.xlane.f32.xlu1 %v1247_v19 }
 0x994   :  { %v1244_v21 = vsel %vm70_vm0, %v1240_v20, 0.0 }
 0x995   :  { %1245 = vadd.xlane.f32.xlu0 %v1244_v21 }
 0xa1c   :  { %v1249_v33 = vpop.xlane.xlu1 %1248 }
 0xa1d   :  { %v1251_v31 = vmul.f32 0.03125, %v1249_v33 }
 0xa1e   :  { %v1246_v22 = vpop.xlane.xlu0 %1245 }
 0xa1f   :  { %v1253_v23 = vsub.f32 %v1241_v18, %v1251_v31  ;;  %v1250_v24 = vmul.f32 0.03125, %v1246_v22 }
 0xa21   :  { %v1252_v25 = vsub.f32 %v1240_v20, %v1250_v24  ;;  %v1255_v26 = vmul.f32 %v1253_v23, %v1253_v23 }
 0xa23   :  { %v1259_v27 = vsel %vm70_vm0, %v1255_v26, 0.0  ;;  %v1254_v28 = vmul.f32 %v1252_v25, %v1252_v25 }
 0xa24   :  { %1260 = vadd.xlane.f32.xlu1 %v1259_v27 }
 0xa25   :  { %v1256_v29 = vsel %vm70_vm0, %v1254_v28, 0.0 }
 0xa26   :  { %1257 = vadd.xlane.f32.xlu0 %v1256_v29 }
 0xaad   :  { %v1261_v37 = vpop.xlane.xlu1 %1260 }
 0xaae   :  { %v1263_v40 = vmul.f32 0.03125, %v1261_v37 }
 0xaaf   :  { %v1258_v38 = vpop.xlane.xlu0 %1257 }
 0xab0   :  { %v1265_v41 = vadd.f32 1e-12, %v1263_v40  ;;  %v1262_v42 = vmul.f32 0.03125, %v1258_v38 }
 0xab2   :  { %3076 = vrsqrt.f32 %v1265_v41  ;;  %v1264_v39 = vadd.f32 1e-12, %v1262_v42 }
 0xab4   :  { %3078 = vrsqrt.f32 %v1264_v39 }
 0xabf   :  { %v3077_v43 = vpop.eup %3076 }
 0xac0   :  { %v1269_v45 = vmul.f32 %v3077_v43, %v1253_v23 }
 0xac1   :  { %v3079_v46 = vpop.eup %3078 }
 0xac2   :  { %v1268_v47 = vmul.f32 %v3079_v46, %v1252_v25  ;;  %v1277_v48 = vmul.f32 %v2673_v44, %v1269_v45 }
 0xac4   :  { %v1276_v50 = vmul.f32 %v2673_v44, %v1268_v47  ;;  %v3477_v53 = vadd.f32 %v2674_v49, %v1277_v48 }
 0xac6   :  { %v3475_v51 = vadd.f32 %v2674_v49, %v1276_v50 }
 0xac8   :  { %2933 = vmatprep.mubr.msk.f32.mxu1 %vm70_vm0, %v3475_v51 }
 0xac9   :  { %2934 = vmatmul.mubr.msk.f32.vlgmr.msra.gmra.mxu1 %vm70_vm0, %v3477_v53 }
 0xaca   :  { %2938 = vmatprep.mubr.msk.f32.mxu1 %vm3133_vm1, %v3132_v34 }
 0xb89   :  { %v2935_v54 = vpop.f32.mrf.mxu1 }
 0xb8a   :  { %v3494_v58 = vadd.f32 %v2935_v54, %v2680_v55 }
 0xb8b   :  { %v1371_v56 = vpop.f32.mrf.mxu1 }
 0xb8c   :  { %v3488_v57 = vadd.f32 %v2680_v55, %v1371_v56 }
 0xb8e   :  { %1548 = vrot.lane.b32.xlu1 %v3488_v57, %s3134_s27  ;;  %1381 = vrot.lane.b32.xlu0 %v3488_v57, %s3135_s28 }
 0xb92   :  { %1546 = vrot.lane.b32.xlu1 %v3488_v57, %s3136_s4  ;;  %1886 = vrot.lane.b32.xlu0 %v3494_v58, %s3134_s27 }
 0xb96   :  { %1719 = vrot.lane.b32.xlu1 %v3494_v58, %s3135_s28 }
 0xb9a   :  { %1884 = vrot.lane.b32.xlu1 %v3494_v58, %s3136_s4 }
 0xc00   :  { %v1549_v59 = vpop.permute.xlu1 %1548  ;;  %v1382_v60 = vpop.permute.xlu0 %1381 }
 0xc01   :  { %2937 = vmatpush3.xpose.msk.msra.mxu1 %vm212_vm2, %v1382_v60  ;;  %2947 = vmatpush3.xpose.msk.msra.mxu0 %vm212_vm2, %v1549_v59  ;;  %v2698_v60 = vld [vmem:[%s3702_s6 + $0x38] sm:$0xff] }
 0xc02   :  { %2956 = vmatprep.subr.mxu0 %v3132_v34  ;;  %2941 = vmatprep.subr.mxu1 %v3132_v34 }
 0xc04   :  { %v1547_v61 = vpop.permute.xlu1 %1546  ;;  %2939 = vmatmul.mubr.msk.f32.vlgmr.msra.gmra.mxu1 %vm212_vm2, %v3488_v57  ;;  %v1887_v63 = vpop.permute.xlu0 %1886 }
 0xc05   :  { %2949 = vmatmul.mubr.msk.f32.vlgmr.msra.gmra.mxu0 %vm212_vm2, %v1547_v61  ;;  %2943 = vmatprep.mubr.msk.f32.mxu1 %vm3133_vm1, %v3132_v34  ;;  %v2697_v61 = vld [vmem:[%s3702_s6 + $0x30] sm:$0xff] }
 0xc06   :  { %2958 = vmatprep.mubr.msk.f32.mxu0 %vm3133_vm1, %v3132_v34 }
 0xc08   :  { %v1720_v62 = vpop.permute.xlu1 %1719 }
 0xc09   :  { %2957 = vmatpush3.xpose.msk.msra.mxu0 %vm212_vm2, %v1720_v62  ;;  %v2696_v62 = vld [vmem:[%s3702_s6 + $0x28] sm:$0xff] }
 0xc0a   :  { %2966 = vmatprep.subr.mxu0 %v3132_v34 }
 0xc0c   :  { %2959 = vmatmul.mubr.msk.f32.vlgmr.msra.gmra.mxu0 %vm212_vm2, %v3494_v58  ;;  %v1885_v1 = vpop.permute.xlu1 %1884 }
 0xc0d   :  { %2967 = vmatpush3.xpose.msk.msra.mxu0 %vm212_vm2, %v1887_v63  ;;  %2968 = vmatprep.mubr.msk.f32.mxu0 %vm3133_vm1, %v3132_v34  ;;  %v2695_v63 = vld [vmem:[%s3702_s6 + $0x20] sm:$0xff] }
 0xc0e   :  { %2976 = vmatprep.subr.mxu0 %v2698_v60 }
 0xc10   :  { %2969 = vmatmul.mubr.msk.f32.vlgmr.msra.gmra.mxu0 %vm212_vm2, %v1885_v1 }
 0xc11   :  { %2977 = vmatpush3.msra.mxu0 %v2698_v60  ;;  %v2712_v60 = vld [vmem:[%s3707_s11 + $0x1] ss:$0 sm:$0xff] }
 0xc12   :  { %2978 = vmatprep.subr.mxu0 %v2697_v61 }
 0xc13   :  { %2979 = vmatpush3.msra.mxu0 %v2697_v61 }
 0xc14   :  { %2980 = vmatprep.subr.mxu0 %v2696_v62 }
 0xc15   :  { %2981 = vmatpush3.msra.mxu0 %v2696_v62 }
 0xc16   :  { %2982 = vmatprep.subr.mxu0 %v2695_v63 }
 0xc17   :  { %2983 = vmatpush3.msra.mxu0 %v2695_v63 }
 0xcc4   :  { %v1453_v2 = vpop.f32.mrf.mxu1 }
 0xcc5   :  { %v1457_v3 = vmul.f32 0.25, %v1453_v2  ;;  %v1620_v4 = vpop.f32.mrf.mxu0 }
 0xcc6   :  { %v1624_v5 = vmul.f32 0.25, %v1620_v4  ;;  %v2940_v6 = vpop.f32.mrf.mxu1 }
 0xcc7   :  { %v2950_v7 = vpop.f32.mrf.mxu0  ;;  %v1458_v8 = vadd.f32 %v1457_v3, %v3329_v52 }
 0xcc8   :  { %v1625_v9 = vadd.f32 %v1624_v5, %v3329_v52 }
 0xcc9   :  { %v1459_v10 = vsel %vm293_vm3, %v1458_v8, -inf }
 0xcca   :  { %1460 = vmax.xlane.f32.xlu0 %v1459_v10  ;;  %v1626_v11 = vsel %vm293_vm3, %v1625_v9, -inf }
 0xccb   :  { %1627 = vmax.xlane.f32.xlu1 %v1626_v11 }
 0xccc   :  { %v1791_v12 = vpop.f32.mrf.mxu0 }
 0xccd   :  { %v1795_v13 = vmul.f32 0.25, %v1791_v12 }
 0xcce   :  { %v2960_v14 = vpop.f32.mrf.mxu0 }
 0xccf   :  { %v1796_v15 = vadd.f32 %v1795_v13, %v3335_v0  ;;  %v2700_v13 = vld [vmem:[%s3703_s7 + $0x1] ss:$0 sm:$0xff] }
 0xcd0   :  { %v1958_v16 = vpop.f32.mrf.mxu0 }
 0xcd1   :  { %v1962_v17 = vmul.f32 0.25, %v1958_v16  ;;  %v1797_v18 = vsel %vm293_vm3, %v1796_v15, -inf }
 0xcd2   :  { %1798 = vmax.xlane.f32.xlu0 %v1797_v18  ;;  %v2970_v19 = vpop.f32.mrf.mxu0 }
 0xcd3   :  { %v1963_v20 = vadd.f32 %v1962_v17, %v3335_v0 }
 0xcd5   :  { %v1964_v52 = vsel %vm293_vm3, %v1963_v20, -inf }
 0xcd6   :  { %1965 = vmax.xlane.f32.xlu0 %v1964_v52 }
 0xd53   :  { %v1461_v21 = vpop.xlane.xlu0 %1460 }
 0xd54   :  { %v1462_v33 = vsub.f32 %v1458_v8, %v1461_v21  ;;  %v1628_v31 = vpop.xlane.xlu1 %1627 }
 0xd55   :  { %v1629_v22 = vsub.f32 %v1625_v9, %v1628_v31 }
 0xd56   :  { %v1463_v23 = vmul.f32 1.442695, %v1462_v33 }
 0xd57   :  { %v1630_v24 = vmul.f32 1.442695, %v1629_v22 }
 0xd58   :  { %3080 = vpow2.f32 %v1463_v23 }
 0xd59   :  { %3082 = vpow2.f32 %v1630_v24 }
 0xd5b   :  { %v1799_v25 = vpop.xlane.xlu0 %1798 }
 0xd5c   :  { %v1800_v26 = vsub.f32 %v1796_v15, %v1799_v25 }
 0xd5e   :  { %v1801_v27 = vmul.f32 1.442695, %v1800_v26 }
 0xd5f   :  { %v1966_v36 = vpop.xlane.xlu0 %1965 }
 0xd60   :  { %3084 = vpow2.f32 %v1801_v27  ;;  %v1967_v37 = vsub.f32 %v1963_v20, %v1966_v36 }
 0xd62   :  { %v1968_v40 = vmul.f32 1.442695, %v1967_v37 }
 0xd64   :  { %3086 = vpow2.f32 %v1968_v40 }
 0xd65   :  { %v3081_v28 = vpop.eup %3080 }
 0xd66   :  { %v3083_v29 = vpop.eup %3082  ;;  %v1465_v30 = vsel %vm293_vm3, %v3081_v28, 0.0 }
 0xd67   :  { %1466 = vadd.xlane.f32.xlu0 %v1465_v30  ;;  %v1632_v0 = vsel %vm293_vm3, %v3083_v29, 0.0  ;;  %v2707_v30 = vld [vmem:[%s3706_s10 + $0x20] sm:$0xff] }
 0xd68   :  { %1633 = vadd.xlane.f32.xlu1 %v1632_v0 }
 0xd6d   :  { %v3085_v32 = vpop.eup %3084 }
 0xd6e   :  { %v1803_v35 = vsel %vm293_vm3, %v3085_v32, 0.0 }
 0xd6f   :  { %1804 = vadd.xlane.f32.xlu0 %v1803_v35 }
 0xd71   :  { %v3087_v38 = vpop.eup %3086 }
 0xd72   :  { %v1970_v41 = vsel %vm293_vm3, %v3087_v38, 0.0 }
 0xd79   :  { %1637 = vrot.lane.b32.xlu1 %v3488_v57, %s3137_s21 }
 0xd7d   :  { %1808 = vrot.lane.b32.xlu1 %v3494_v58, %s3138_s1 }
 0xd85   :  { %1470 = vrot.lane.b32.xlu0 %v3488_v57, %s3138_s1 }
 0xda1   :  { %1971 = vadd.xlane.f32.xlu1 %v1970_v41  ;;  %v2705_v41 = vld [vmem:[%s3704_s8 + $0x1] ss:$0 sm:$0xff] }
 0xdb2   :  { %1975 = vrot.lane.b32.xlu1 %v3494_v58, %s3137_s21 }
 0xdf0   :  { %v1467_v42 = vpop.xlane.xlu0 %1466 }
 0xdf1   :  { %3088 = vrcp.f32 %v1467_v42  ;;  %v1634_v39 = vpop.xlane.xlu1 %1633 }
 0xdf2   :  { %3090 = vrcp.f32 %v1634_v39  ;;  %v2706_v39 = vld [vmem:[%s3705_s9 + $0x1] ss:$0 sm:$0xff] }
 0xdf5   :  { %v1638_v46 = vpop.permute.xlu1 %1637 }
 0xdf8   :  { %v1805_v43 = vpop.xlane.xlu0 %1804 }
 0xdf9   :  { %3092 = vrcp.f32 %v1805_v43  ;;  %v1809_v50 = vpop.permute.xlu1 %1808 }
 0xdfc   :  { %v1471_v44 = vpop.permute.xlu0 %1470 }
 0xdfd   :  { %2942 = vmatpush3.msra.mxu1 %v1471_v44 }
 0xdfe   :  { %v3089_v45 = vpop.eup %3088  ;;  %2951 = vmatprep.subr.mxu1 %v3132_v34 }
 0xdff   :  { %v1469_v47 = vmul.f32 %v3089_v45, %v3081_v28  ;;  %v3091_v48 = vpop.eup %3090  ;;  %v2709_v28 = vld [vmem:[%s3706_s10 + $0x30] sm:$0xff] }
 0xe00   :  { %v1636_v49 = vmul.f32 %v3091_v48, %v3083_v29  ;;  %v2708_v29 = vld [vmem:[%s3706_s10 + $0x28] sm:$0xff] }
 0xe01   :  { %2944 = vmatmul.mubr.msk.f32.vlgmr.msra.gmra.mxu1 %vm293_vm3, %v1469_v47 }
 0xe02   :  { %2952 = vmatpush3.msra.mxu1 %v1638_v46  ;;  %2953 = vmatprep.mubr.msk.f32.mxu1 %vm3133_vm1, %v3132_v34 }
 0xe03   :  { %2961 = vmatprep.subr.mxu1 %v3132_v34 }
 0xe05   :  { %2954 = vmatmul.mubr.msk.f32.vlgmr.msra.gmra.mxu1 %vm293_vm3, %v1636_v49  ;;  %v2722_v49 = vld [vmem:[%s3708_s12 + $0x78] sm:$0xff] }
 0xe06   :  { %v3093_v54 = vpop.eup %3092  ;;  %2962 = vmatpush3.msra.mxu1 %v1809_v50  ;;  %2963 = vmatprep.mubr.msk.f32.mxu1 %vm3133_vm1, %v3132_v34  ;;  %v2721_v50 = vld [vmem:[%s3708_s12 + $0x70] sm:$0xff] }
 0xe07   :  { %v1807_v55 = vmul.f32 %v3093_v54, %v3085_v32  ;;  %2971 = vmatprep.subr.mxu1 %v3132_v34  ;;  %2998 = vmatprep.subr.mxu0 %v2722_v49  ;;  %v2720_v54 = vld [vmem:[%s3708_s12 + $0x68] sm:$0xff] }
 0xe09   :  { %2964 = vmatmul.mubr.msk.f32.vlgmr.msra.gmra.mxu1 %vm293_vm3, %v1807_v55  ;;  %v2719_v55 = vld [vmem:[%s3708_s12 + $0x60] sm:$0xff] }
 0xe0a   :  { %2973 = vmatprep.mubr.msk.f32.mxu1 %vm3133_vm1, %v3132_v34 }
 0xe2a   :  { %v1972_v56 = vpop.xlane.xlu1 %1971 }
 0xe2b   :  { %3094 = vrcp.f32 %v1972_v56  ;;  %v2718_v56 = vld [vmem:[%s3708_s12 + $0x58] sm:$0xff] }
 0xe2e   :  { %v1976_v57 = vpop.permute.xlu1 %1975 }
 0xe2f   :  { %2972 = vmatpush3.msra.mxu1 %v1976_v57  ;;  %v2717_v57 = vld [vmem:[%s3708_s12 + $0x50] sm:$0xff] }
 0xe38   :  { %v3095_v58 = vpop.eup %3094 }
 0xe39   :  { %v1974_v59 = vmul.f32 %v3095_v58, %v3087_v38  ;;  %v2716_v58 = vld [vmem:[%s3708_s12 + $0x48] sm:$0xff] }
 0xe3b   :  { %2974 = vmatmul.mubr.msk.f32.vlgmr.msra.gmra.mxu1 %vm293_vm3, %v1974_v59  ;;  %v2715_v59 = vld [vmem:[%s3708_s12 + $0x40] sm:$0xff] }
 0xec1   :  { %v1542_v1 = vpop.f32.mrf.mxu1 }
 0xec3   :  { %v2945_v2 = vpop.f32.mrf.mxu1 }
 0xec5   :  { %v1709_v3 = vpop.f32.mrf.mxu1 }
 0xec6   :  { %1714 = vrot.lane.b32.xlu0 %v1709_v3, %s3139_s0 }
 0xec7   :  { %v2955_v4 = vpop.f32.mrf.mxu1 }
 0xec9   :  { %v1880_v5 = vpop.f32.mrf.mxu1 }
 0xecb   :  { %v2965_v6 = vpop.f32.mrf.mxu1 }
 0xefb   :  { %v2047_v7 = vpop.f32.mrf.mxu1 }
 0xefc   :  { %2052 = vrot.lane.b32.xlu1 %v2047_v7, %s3139_s0 }
 0xefd   :  { %v2975_v8 = vpop.f32.mrf.mxu1 }
 0xf38   :  { %v1715_v9 = vpop.permute.xlu0 %1714 }
 0xf39   :  { %v1717_v10 = vsel %vm212_vm2, %v1542_v1, %v1715_v9 }
 0xf3a   :  { %2984 = vmatprep.mubr.msk.f32.mxu0 %vm70_vm0, %v1717_v10 }
 0xf6e   :  { %v2053_v11 = vpop.permute.xlu1 %2052 }
 0xf6f   :  { %v2055_v12 = vsel %vm212_vm2, %v1880_v5, %v2053_v11 }
 0xf70   :  { %2985 = vmatmul.mubr.msk.f32.vlgmr.msra.gmra.mxu0 %vm70_vm0, %v2055_v12 }
 0xf71   :  { %2999 = vmatpush3.msra.mxu0 %v2722_v49 }
 0xf72   :  { %3000 = vmatprep.subr.mxu0 %v2721_v50 }
 0xf73   :  { %3001 = vmatpush3.msra.mxu0 %v2721_v50  ;;  %v2730_v50 = vld [vmem:[%s3711_s15 + $0x1] ss:$0 sm:$0xff] }
 0xf74   :  { %3002 = vmatprep.subr.mxu0 %v2720_v54 }
 0xf75   :  { %3003 = vmatpush3.msra.mxu0 %v2720_v54 }
 0xf76   :  { %3004 = vmatprep.subr.mxu0 %v2719_v55 }
 0xf77   :  { %3005 = vmatpush3.msra.mxu0 %v2719_v55 }
 0xf78   :  { %3006 = vmatprep.subr.mxu0 %v2718_v56 }
 0xf79   :  { %3007 = vmatpush3.msra.mxu0 %v2718_v56 }
 0xf7a   :  { %3008 = vmatprep.subr.mxu0 %v2717_v57 }
 0xf7b   :  { %3009 = vmatpush3.msra.mxu0 %v2717_v57 }
 0xf7c   :  { %3010 = vmatprep.subr.mxu0 %v2716_v58 }
 0xf7d   :  { %3011 = vmatpush3.msra.mxu0 %v2716_v58 }
 0xf7e   :  { %3012 = vmatprep.subr.mxu0 %v2715_v59 }
 0xf7f   :  { %3013 = vmatpush3.msra.mxu0 %v2715_v59 }
0x1030   :  { %v2986_v14 = vpop.f32.mrf.mxu0 }
0x1031   :  { %v2147_v15 = vadd.f32 %v2986_v14, %v2700_v13 }
0x1032   :  { %v2141_v16 = vpop.f32.mrf.mxu0 }
0x1033   :  { %v2142_v17 = vadd.f32 %v2700_v13, %v2141_v16  ;;  %v2151_v18 = vadd.f32 %v2147_v15, %v3477_v53 }
0x1035   :  { %v2159_v19 = vsel %vm70_vm0, %v2151_v18, 0.0  ;;  %v2150_v20 = vadd.f32 %v2142_v17, %v3475_v51  ;;  %v2710_v51 = vld [vmem:[%s3706_s10 + $0x38] sm:$0xff] }
0x1036   :  { %2160 = vadd.xlane.f32.xlu1 %v2159_v19  ;;  %2987 = vmatprep.subr.mxu1 %v2710_v51 }
0x1037   :  { %v2156_v52 = vsel %vm70_vm0, %v2150_v20, 0.0  ;;  %2988 = vmatpush3.msra.mxu1 %v2710_v51 }
0x1038   :  { %2157 = vadd.xlane.f32.xlu0 %v2156_v52  ;;  %2989 = vmatprep.subr.mxu1 %v2709_v28 }
0x1039   :  { %2990 = vmatpush3.msra.mxu1 %v2709_v28 }
0x103a   :  { %2991 = vmatprep.subr.mxu1 %v2708_v29 }
0x103b   :  { %2992 = vmatpush3.msra.mxu1 %v2708_v29 }
0x103c   :  { %2993 = vmatprep.subr.mxu1 %v2707_v30 }
0x103d   :  { %2994 = vmatpush3.msra.mxu1 %v2707_v30 }
0x103e   :  { %3017 = vmatprep.subr.mxu1 %v3132_v34 }
0x10bf   :  { %v2161_v21 = vpop.xlane.xlu1 %2160 }
0x10c0   :  { %v2163_v33 = vmul.f32 0.03125, %v2161_v21 }
0x10c1   :  { %v2158_v31 = vpop.xlane.xlu0 %2157 }
0x10c2   :  { %v2162_v22 = vmul.f32 0.03125, %v2158_v31  ;;  %v2165_v23 = vsub.f32 %v2151_v18, %v2163_v33 }
0x10c4   :  { %v2164_v24 = vsub.f32 %v2150_v20, %v2162_v22  ;;  %v2167_v27 = vmul.f32 %v2165_v23, %v2165_v23  ;;  %v2724_v20 = vld [vmem:[%s3709_s13 + $0x1] ss:$0 sm:$0xff] }
0x10c6   :  { %v2166_v25 = vmul.f32 %v2164_v24, %v2164_v24  ;;  %v2171_v53 = vsel %vm70_vm0, %v2167_v27, 0.0 }
0x10c8   :  { %v2168_v26 = vsel %vm70_vm0, %v2166_v25, 0.0 }
0x10c9   :  { %2169 = vadd.xlane.f32.xlu0 %v2168_v26 }
0x10cd   :  { %2172 = vadd.xlane.f32.xlu0 %v2171_v53 }
0x1152   :  { %v2170_v0 = vpop.xlane.xlu0 %2169 }
0x1153   :  { %v2174_v32 = vmul.f32 0.03125, %v2170_v0 }
0x1155   :  { %v2176_v35 = vadd.f32 1e-12, %v2174_v32 }
0x1156   :  { %v2173_v36 = vpop.xlane.xlu0 %2172 }
0x1157   :  { %3096 = vrsqrt.f32 %v2176_v35  ;;  %v2175_v37 = vmul.f32 0.03125, %v2173_v36  ;;  %v2464_v36 = vld [vmem:[%s3712_s16 + $0x18] sm:$0xff] }
0x1159   :  { %v2177_v40 = vadd.f32 1e-12, %v2175_v37  ;;  %v2463_v37 = vld [vmem:[%s3712_s16 + $0x10] sm:$0xff] }
0x115b   :  { %3098 = vrsqrt.f32 %v2177_v40  ;;  %v2462_v40 = vld [vmem:[%s3712_s16 + $0x8] sm:$0xff] }
0x1164   :  { %v3097_v38 = vpop.eup %3096 }
0x1165   :  { %v2180_v42 = vmul.f32 %v3097_v38, %v2164_v24  ;;  %v2461_v38 = vld [vmem:[%s3712_s16] sm:$0xff] }
0x1167   :  { %v2188_v43 = vmul.f32 %v2705_v41, %v2180_v42 }
0x1168   :  { %v3099_v44 = vpop.eup %3098 }
0x1169   :  { %v2181_v45 = vmul.f32 %v3099_v44, %v2165_v23  ;;  %v3602_v46 = vadd.f32 %v2706_v39, %v2188_v43 }
0x116b   :  { %v2189_v47 = vmul.f32 %v2705_v41, %v2181_v45  ;;  %2995 = vmatprep.mubr.msk.f32.mxu1 %vm70_vm0, %v3602_v46 }
0x116d   :  { %v2197_v48 = vadd.f32 %v2706_v39, %v2189_v47  ;;  %v2729_v47 = vld [vmem:[%s3710_s14 + $0x1] ss:$0 sm:$0xff] }
0x116f   :  { %2996 = vmatmul.mubr.msk.f32.vlgmr.msra.gmra.mxu1 %vm70_vm0, %v2197_v48 }
0x1170   :  { %3025 = vmatprep.mubr.msk.f32.mxu1 %vm3133_vm1, %v3132_v34  ;;  %3018 = vmatpush3.msra.mxu1 %v2464_v36 }
0x1171   :  { %3019 = vmatprep.subr.mxu1 %v3132_v34 }
0x1172   :  { %3020 = vmatpush3.msra.mxu1 %v2463_v37 }
0x1173   :  { %3021 = vmatprep.subr.mxu1 %v3132_v34 }
0x1174   :  { %3022 = vmatpush3.msra.mxu1 %v2462_v40 }
0x1175   :  { %3023 = vmatprep.subr.mxu1 %v3132_v34 }
0x1176   :  { %3024 = vmatpush3.msra.mxu1 %v2461_v38 }
0x1177   :  { %3028 = vmatprep.subr.mxu1 %v3132_v34 }
0x122f   :  { %v2997_v61 = vpop.f32.mrf.mxu1 }
0x1230   :  { %v2289_v62 = vadd.f32 %v2997_v61, %v2712_v60  ;;  %v2549_v61 = vld [vmem:[%s3714_s18 + $0x18] sm:$0xff] }
0x1231   :  { %v2283_v63 = vpop.f32.mrf.mxu1 }
0x1232   :  { %v2295_v1 = vmul.f32 0.044715, %v2289_v62  ;;  %v2284_v2 = vadd.f32 %v2712_v60, %v2283_v63  ;;  %v2293_v17 = vmul.f32 0.5, %v2289_v62  ;;  %v2547_v63 = vld [vmem:[%s3714_s18 + $0x8] sm:$0xff] }
0x1234   :  { %v2297_v3 = vmul.f32 %v2295_v1, %v2289_v62  ;;  %v2294_v4 = vmul.f32 0.044715, %v2284_v2  ;;  %v2292_v15 = vmul.f32 0.5, %v2284_v2  ;;  %v2546_v1 = vld [vmem:[%s3714_s18] sm:$0xff] }
0x1236   :  { %v2299_v5 = vmul.f32 %v2297_v3, %v2289_v62  ;;  %v2296_v6 = vmul.f32 %v2294_v4, %v2284_v2 }
0x1238   :  { %v2301_v7 = vadd.f32 %v2299_v5, %v2289_v62  ;;  %v2298_v8 = vmul.f32 %v2296_v6, %v2284_v2  ;;  %v2548_v62 = vld [vmem:[%s3714_s18 + $0x10] sm:$0xff]  ;;  %s3140_s18 = smov [#allocation2]  }
0x1239   :  { %s2637_s5 = sshll.u32 %s3140_s18, 4  ;;  %s2638_s5 = int_to_ptr.vmem [resolvable:$true] %s2637_s5 }
0x123a   :  { %v2303_v9 = vmul.f32 0.7978846, %v2301_v7  ;;  %v2300_v10 = vadd.f32 %v2298_v8, %v2284_v2  ;;  %v2731_v2 = vld [vmem:[%s3713_s17] ss:$0 sm:$0xff]  ;;  %s3110_s11 = scalar_lea.vmem %s2638_s5, 32  ;;  %p3115_p1 = scmp.lt.s32.totalorder %s2638_s5, %s2638_s5 }
0x123b   :  { %v2733_v7 = vld [vmem:[%s3715_s19] ss:$0 sm:$0xff]  ;;  %p3111_p0 = scmp.ne.s32.totalorder %s2638_s5, %s3110_s11  ;;  %p3116_p2 = scmp.lt.s32.totalorder %s3110_s11, %s3110_s11 }
0x123c   :  { %3100 = vtanh.f32 %v2303_v9  ;;  %v2302_v11 = vmul.f32 0.7978846, %v2300_v10 }
0x123d   :  { %p3117_p3 = por %p3116_p2, %p3115_p1 }
0x123e   :  { %3102 = vtanh.f32 %v2302_v11 }
0x123f   :  { %p3118_p4 = pnand %p3117_p3, %p3111_p0 }
0x1249   :  { %v3101_v12 = vpop.eup %3100 }
0x124a   :  { %v2307_v14 = vadd.f32 1.0, %v3101_v12 }
0x124b   :  { %v3103_v13 = vpop.eup %3102 }
0x124c   :  { %v2306_v16 = vadd.f32 1.0, %v3103_v13  ;;  %v2309_v19 = vmul.f32 %v2307_v14, %v2293_v17 }
0x124e   :  { %v2308_v18 = vmul.f32 %v2306_v16, %v2292_v15 }
0x1250   :  { %3014 = vmatprep.mubr.msk.f32.mxu0 %vm1158_vm4, %v2308_v18 }
0x1251   :  { %3015 = vmatmul.mubr.msk.f32.vlgmr.msra.gmra.mxu0 %vm1158_vm4, %v2309_v19 }
0x1311   :  { %v3016_v52 = vpop.f32.mrf.mxu0 }
0x1312   :  { %v2405_v21 = vadd.f32 %v3016_v52, %v2724_v20 }
0x1313   :  { %v2399_v33 = vpop.f32.mrf.mxu0 }
0x1314   :  { %v2400_v31 = vadd.f32 %v2724_v20, %v2399_v33  ;;  %v2409_v22 = vadd.f32 %v2405_v21, %v2197_v48 }
0x1316   :  { %v2417_v23 = vsel %vm70_vm0, %v2409_v22, 0.0  ;;  %v2408_v24 = vadd.f32 %v2400_v31, %v3602_v46 }
0x1317   :  { %2418 = vadd.xlane.f32.xlu0 %v2417_v23 }
0x1318   :  { %v2414_v25 = vsel %vm70_vm0, %v2408_v24, 0.0 }
0x1319   :  { %2415 = vadd.xlane.f32.xlu1 %v2414_v25 }
0x13a0   :  { %v2419_v26 = vpop.xlane.xlu0 %2418 }
0x13a1   :  { %v2421_v27 = vmul.f32 0.03125, %v2419_v26 }
0x13a2   :  { %v2416_v53 = vpop.xlane.xlu1 %2415 }
0x13a3   :  { %v2423_v51 = vsub.f32 %v2409_v22, %v2421_v27  ;;  %v2420_v28 = vmul.f32 0.03125, %v2416_v53 }
0x13a5   :  { %v2422_v29 = vsub.f32 %v2408_v24, %v2420_v28  ;;  %v2425_v30 = vmul.f32 %v2423_v51, %v2423_v51 }
0x13a7   :  { %v2429_v0 = vsel %vm70_vm0, %v2425_v30, 0.0  ;;  %v2424_v32 = vmul.f32 %v2422_v29, %v2422_v29 }
0x13a8   :  { %2430 = vadd.xlane.f32.xlu0 %v2429_v0 }
0x13a9   :  { %v2426_v35 = vsel %vm70_vm0, %v2424_v32, 0.0 }
0x13aa   :  { %2427 = vadd.xlane.f32.xlu1 %v2426_v35 }
0x1431   :  { %v2431_v41 = vpop.xlane.xlu0 %2430 }
0x1432   :  { %v2433_v42 = vmul.f32 0.03125, %v2431_v41 }
0x1433   :  { %v2428_v39 = vpop.xlane.xlu1 %2427 }
0x1434   :  { %v2435_v43 = vadd.f32 1e-12, %v2433_v42  ;;  %v2432_v44 = vmul.f32 0.03125, %v2428_v39 }
0x1436   :  { %3104 = vrsqrt.f32 %v2435_v43  ;;  %v2434_v45 = vadd.f32 1e-12, %v2432_v44 }
0x1438   :  { %3106 = vrsqrt.f32 %v2434_v45 }
0x1443   :  { %v3105_v46 = vpop.eup %3104 }
0x1444   :  { %v2439_v48 = vmul.f32 %v3105_v46, %v2423_v51 }
0x1445   :  { %v3107_v49 = vpop.eup %3106 }
0x1446   :  { %v2438_v54 = vmul.f32 %v3107_v49, %v2422_v29  ;;  %v2447_v55 = vmul.f32 %v2729_v47, %v2439_v48 }
0x1448   :  { %v2446_v56 = vmul.f32 %v2729_v47, %v2438_v54  ;;  %v2455_v57 = vadd.f32 %v2730_v50, %v2447_v55 }
0x144a   :  { %v2454_v58 = vadd.f32 %v2730_v50, %v2446_v56  ;;  %v2457_v59 = vrot.slane %v2455_v57, 7 }
0x144c   :  { %v2460_v60 = vsel %vm2459_vm5, %v2454_v58, %v2457_v59 }
0x144d   :  { %3026 = vmatmul.mubr.msk.f32.vlgmr.msra.gmra.mxu1 %vm70_vm0, %v2460_v60 }
0x144e   :  { %3036 = vmatprep.mubr.msk.f32.mxu1 %vm3133_vm1, %v3132_v34  ;;  %3029 = vmatpush3.msra.mxu1 %v2549_v61 }
0x144f   :  { %3030 = vmatprep.subr.mxu1 %v3132_v34 }
0x1450   :  { %3031 = vmatpush3.msra.mxu1 %v2548_v62 }
0x1451   :  { %3032 = vmatprep.subr.mxu1 %v3132_v34 }
0x1452   :  { %3033 = vmatpush3.msra.mxu1 %v2547_v63 }
0x1453   :  { %3034 = vmatprep.subr.mxu1 %v3132_v34 }
0x1454   :  { %3035 = vmatpush3.msra.mxu1 %v2546_v1 }
0x150d   :  { %v2541_v3 = vpop.f32.mrf.mxu1 }
0x150e   :  { %v2542_v4 = vadd.f32 %v2731_v2, %v2541_v3 }
0x150f   :  { %v3027_v5 = vpop.f32.mrf.mxu1 }
0x1510   :  { %3108 = vtanh.f32 %v2542_v4 }
0x151d   :  { %v3109_v6 = vpop.eup %3108 }
0x151e   :  { %3037 = vmatmul.mubr.msk.f32.vlgmr.msra.gmra.mxu1 %vm70_vm0, %v3109_v6 }
0x15de   :  { %v2626_v8 = vpop.f32.mrf.mxu1 }
0x15df   :  { %v2627_v34 = vadd.f32 %v2733_v7, %v2626_v8 }
0x15e0   :  { %v3038_v9 = vpop.f32.mrf.mxu1 }
0x15e1   :  { %2630 = vst [vmem:[#allocation2] sm:$0x3] %v2627_v34 }
0x15e2   :  { %3121 = shalt.err (!%p3118_p4)
}
0x15e3   :  { %2640 = dma.vmem_to_hbm [thread:$0]  %s2638_s5, 32, %s3716_s20, [#allocation3]  }
0x15e4   :  { %3130 = dma.done.wait [#allocation3], 32  }
0x15e5   :  { %3131 = vsyncadd [#allocation3], 4294967264 }
0x15e6   :  { %2644 = vsyncpa [#allocation3], 1 }

</bundles_post_ra>
